<compile_context>
chip_gen: v7x
topology: tpu7x:2x2x1
jax: 0.10.0
libtpu: 0.0.40
codegen_flags: <defaults>
</compile_context>

<pallas_src>
import jax
import jax.numpy as jnp
from jax import lax
from jax.experimental import pallas as pl
from jax.experimental.pallas import tpu as pltpu

INPUT_SIZE = 9
OUTPUT_SIZE = 9
HIDDEN = (256, 128, 64, 32)
DIMS = (INPUT_SIZE,) + HIDDEN + (OUTPUT_SIZE,)
OUT_DIMS = DIMS[1:]                        # (256, 128, 64, 32, 9)

_BIAS_OFFSETS = []
_off = 0
for _d in OUT_DIMS:
    _BIAS_OFFSETS.append(_off)
    _off += _d
BIAS_TOTAL = _off                          # 489
BIAS_TOTAL_PADDED = ((BIAS_TOTAL + 7) // 8) * 8    # 496 (sublane-aligned)

MACS = sum(i * o for i, o in zip(DIMS[:-1], DIMS[1:]))   # 45600 weight MACs


def kinematic_mlp_kernel(x_ref,
                         w1_ref, w2_ref, w3_ref, w4_ref, w5_ref,
                         bcat_ref, o_ref):
    # x_ref: (batch_tile, 9) batch-major input block
    # w*:    PyTorch-style (out, in) weights, f32 or bf16
    # bcat:  (496, 1) f32 concatenated biases
    # o_ref: (9, batch_tile) feature-major, lane-dense output block
    w_refs = (w1_ref, w2_ref, w3_ref, w4_ref, w5_ref)
    n_layers = len(w_refs)
    compute_dtype = w1_ref.dtype

    # Layer 1: contract the 9-wide feature axis of the batch-major block
    # directly against W1's `in` axis (A @ B^T form on the MXU) -> (256, T).
    # This replaces the old wrapper-side x.T HBM transpose.
    x = x_ref[...].astype(compute_dtype)                       # (T, 9)
    h = lax.dot_general(w1_ref[...], x,
                        dimension_numbers=(((1,), (1,)), ((), ())),
                        preferred_element_type=jnp.float32)    # (256, T) f32
    h = h + bcat_ref[0:OUT_DIMS[0], :]                         # f32 bias
    h = jnp.maximum(h, 0.0).astype(compute_dtype)              # cast right after ReLU

    for li in range(1, n_layers):
        w = w_refs[li][...]                                    # (out, in)
        off = _BIAS_OFFSETS[li]
        out_dim = OUT_DIMS[li]
        h = jnp.dot(w, h, preferred_element_type=jnp.float32)  # MXU, f32 acc
        h = h + bcat_ref[off:off + out_dim, :]                 # f32 bias (VPU)
        if li < n_layers - 1:
            h = jnp.maximum(h, 0.0).astype(compute_dtype)      # bf16 live value

    o_ref[...] = h.astype(o_ref.dtype)                         # (9, T) full-lane store


def _choose_batch_tile(batch, cap=2048):
    """Largest tile (multiple of 128, <= cap) giving >=2 grid steps when the
    batch allows it, preferring an EVEN grid so v7x's 2 TCs split evenly."""
    n_chunks = -(-batch // 128)                  # ceil(B / 128)
    if n_chunks <= 1:
        return 128
    max_chunks = max(1, cap // 128)
    grid = max(2, -(-n_chunks // max_chunks))
    if grid % 2:
        grid += 1                                # even grid for 2-TC balance
    chunks_per_tile = -(-n_chunks // grid)
    return chunks_per_tile * 128


def kinematic_mlp(x, params, *, batch_tile=None, param_dtype=jnp.bfloat16,
                  feature_major_output=False):
    """x: (B, INPUT_SIZE) float32.

    params: list of (W, b) with W (out_features, in_features) and b (out_features,)
    exactly as PyTorch nn.Linear stores them.

    param_dtype=bfloat16 (default) feeds the MXU bf16 operands with f32
    accumulation (best on v5e/v6e/v7x); pass jnp.float32 for exact matching.
    """
    B, in_dim = x.shape
    assert in_dim == INPUT_SIZE

    if batch_tile is None:
        batch_tile = _choose_batch_tile(B)
    assert batch_tile % 128 == 0

    grid = -(-B // batch_tile)
    Bp = grid * batch_tile
    if Bp != B:
        # Padded rows compute ReLU(b) garbage and are sliced off below.
        x = jnp.pad(x, ((0, Bp - B), (0, 0)))

    # Weights stay in PyTorch (out, in) layout; cast to the MXU operand dtype.
    ws = [w.astype(param_dtype) for (w, _) in params]

    # All biases concatenated into one sublane-aligned (496, 1) f32 column.
    bias_cols = [b.reshape(-1, 1).astype(jnp.float32) for (_, b) in params]
    bias_cols.append(jnp.zeros((BIAS_TOTAL_PADDED - BIAS_TOTAL, 1), jnp.float32))
    bcat = jnp.concatenate(bias_cols, axis=0)          # (496, 1)

    in_specs = [pl.BlockSpec((batch_tile, INPUT_SIZE), lambda i: (i, 0))]
    in_specs += [pl.BlockSpec(w.shape, lambda i: (0, 0)) for w in ws]
    in_specs += [pl.BlockSpec(bcat.shape, lambda i: (0, 0))]
    out_spec = pl.BlockSpec((OUTPUT_SIZE, batch_tile), lambda i: (0, i))

    param_bytes = sum(int(w.size) * w.dtype.itemsize for w in ws) + int(bcat.size) * 4
    cost = pl.CostEstimate(
        flops=2 * MACS * Bp,
        transcendentals=0,
        bytes_accessed=int(Bp * INPUT_SIZE * 4 + Bp * OUTPUT_SIZE * 4 + param_bytes),
    )

    out_t = pl.pallas_call(
        kinematic_mlp_kernel,
        out_shape=jax.ShapeDtypeStruct((OUTPUT_SIZE, Bp), x.dtype),
        grid_spec=pltpu.PrefetchScalarGridSpec(
            num_scalar_prefetch=0,
            grid=(grid,),
            in_specs=in_specs,
            out_specs=out_spec,
        ),
        compiler_params=pltpu.CompilerParams(
            dimension_semantics=("parallel",),
            vmem_limit_bytes=32 * 1024 * 1024),
        cost_estimate=cost,
    )(x, *ws, bcat)

    out_t = out_t[:, :B]                       # (9, B)
    if feature_major_output:
        return out_t                           # feature-major, no extra transpose
    return out_t.T                             # (B, 9) to match PyTorch layout


def init_params(key):
    """PyTorch-style init: W (out, in), b (out,), U(-1/sqrt(fan_in), 1/sqrt(fan_in))."""
    params = []
    for fan_in, fan_out in zip(DIMS[:-1], DIMS[1:]):
        key, kw, kb = jax.random.split(key, 3)
        bound = 1.0 / jnp.sqrt(float(fan_in))
        w = jax.random.uniform(kw, (fan_out, fan_in), jnp.float32, -bound, bound)
        b = jax.random.uniform(kb, (fan_out,), jnp.float32, -bound, bound)
        params.append((w, b))
    return params


def reference_mlp(x, params):
    h = x
    n = len(params)
    for idx, (w, b) in enumerate(params):
        h = h @ w.T + b
        if idx < n - 1:
            h = jnp.maximum(h, 0.0)
    return h


if __name__ == "__main__":
    key = jax.random.PRNGKey(0)
    key, kx = jax.random.split(key)

    B = 384                                    # ragged: pads to 512, grid of 2 (even)
    x = jax.random.normal(kx, (B, INPUT_SIZE), jnp.float32)
    params = init_params(key)
    ref = reference_mlp(x, params)

    # Default bf16-operand path (v5e/v6e/v7x MXU-friendly), f32 accumulation.
    out = jax.block_until_ready(kinematic_mlp(x, params))
    assert out.shape == (B, OUTPUT_SIZE)
    assert jnp.allclose(out, ref, atol=5e-2, rtol=5e-2), "bf16 kernel mismatch"

    # Exact f32 path.
    out_f32 = jax.block_until_ready(kinematic_mlp(x, params, param_dtype=jnp.float32))
    assert jnp.allclose(out_f32, ref, atol=1e-3, rtol=1e-3), "f32 kernel mismatch"

    # Single-tile (grid == 1) path with heavy padding.
    x_small = x[:64]
    out_small = jax.block_until_ready(
        kinematic_mlp(x_small, params, param_dtype=jnp.float32))
    assert jnp.allclose(out_small, ref[:64], atol=1e-3, rtol=1e-3), \
        "single-tile mismatch"

    # Feature-major output path (no final transpose for fused consumers).
    out_fm = jax.block_until_ready(
        kinematic_mlp(x, params, feature_major_output=True))
    assert out_fm.shape == (OUTPUT_SIZE, B)
    assert jnp.allclose(out_fm.T, ref, atol=5e-2, rtol=5e-2), \
        "feature-major mismatch"

    print("KERNEL_OK")
</pallas_src>

<mosaic_0001>
module attributes {stable_mosaic.version = 11 : i64} {
  func.func @kinematic_mlp_kernel(%arg0: i32, %arg1: memref<256x9xf32, #tpu.memory_space<vmem>>, %arg2: memref<256x9xbf16, #tpu.memory_space<vmem>>, %arg3: memref<128x256xbf16, #tpu.memory_space<vmem>>, %arg4: memref<64x128xbf16, #tpu.memory_space<vmem>>, %arg5: memref<32x64xbf16, #tpu.memory_space<vmem>>, %arg6: memref<9x32xbf16, #tpu.memory_space<vmem>>, %arg7: memref<496x1xf32, #tpu.memory_space<vmem>>, %arg8: memref<9x256xf32, #tpu.memory_space<vmem>>) attributes {dimension_semantics = [#tpu.dimension_semantics<parallel>], iteration_bounds = array<i64: 2>, scalar_prefetch = 0 : i64, scratch_operands = 0 : i64, tpu.core_type = #tpu.core_type<tc>, window_params = [{transform_indices = @transform_0, window_bounds = array<i64: 256, 9>}, {pipeline_mode = #tpu.pipeline_mode<synchronous>, transform_indices = @transform_1, window_bounds = array<i64: 256, 9>}, {pipeline_mode = #tpu.pipeline_mode<synchronous>, transform_indices = @transform_2, window_bounds = array<i64: 128, 256>}, {pipeline_mode = #tpu.pipeline_mode<synchronous>, transform_indices = @transform_3, window_bounds = array<i64: 64, 128>}, {pipeline_mode = #tpu.pipeline_mode<synchronous>, transform_indices = @transform_4, window_bounds = array<i64: 32, 64>}, {pipeline_mode = #tpu.pipeline_mode<synchronous>, transform_indices = @transform_5, window_bounds = array<i64: 9, 32>}, {pipeline_mode = #tpu.pipeline_mode<synchronous>, transform_indices = @transform_6, window_bounds = array<i64: 496, 1>}, {transform_indices = @transform_7, window_bounds = array<i64: 9, 256>}]} {
    %c0 = arith.constant 0 : index
    %c0_0 = arith.constant 0 : index
    %0 = vector.load %arg1[%c0, %c0_0] : memref<256x9xf32, #tpu.memory_space<vmem>>, vector<256x9xf32>
    %1 = arith.truncf %0 : vector<256x9xf32> to vector<256x9xbf16>
    %c0_1 = arith.constant 0 : index
    %c0_2 = arith.constant 0 : index
    %2 = vector.load %arg2[%c0_1, %c0_2] : memref<256x9xbf16, #tpu.memory_space<vmem>>, vector<256x9xbf16>
    %cst = arith.constant dense<0.000000e+00> : vector<256x256xf32>
    %3 = tpu.matmul %2, %1, %cst {dimension_numbers = #tpu.dot_dimension_numbers<[1], [1], [0], [0], [0, 0, 1, 0], [], []>} : vector<256x9xbf16>, vector<256x9xbf16>, vector<256x256xf32> -> vector<256x256xf32>
    %c0_3 = arith.constant 0 : index
    %c0_4 = arith.constant 0 : index
    %4 = vector.load %arg7[%c0_3, %c0_4] : memref<496x1xf32, #tpu.memory_space<vmem>>, vector<256x1xf32>
    %5 = vector.broadcast %4 : vector<256x1xf32> to vector<256x256xf32>
    %6 = arith.addf %3, %5 : vector<256x256xf32>
    %cst_5 = arith.constant 0.000000e+00 : f32
    %7 = vector.broadcast %cst_5 : f32 to vector<256x256xf32>
    %8 = arith.maximumf %6, %7 : vector<256x256xf32>
    %9 = arith.truncf %8 : vector<256x256xf32> to vector<256x256xbf16>
    %c0_6 = arith.constant 0 : index
    %c0_7 = arith.constant 0 : index
    %10 = vector.load %arg3[%c0_6, %c0_7] : memref<128x256xbf16, #tpu.memory_space<vmem>>, vector<128x256xbf16>
    %cst_8 = arith.constant dense<0.000000e+00> : vector<128x256xf32>
    %11 = tpu.matmul %10, %9, %cst_8 {dimension_numbers = #tpu.dot_dimension_numbers<[1], [0], [0], [1], [0, 0, 1, 1], [], []>} : vector<128x256xbf16>, vector<256x256xbf16>, vector<128x256xf32> -> vector<128x256xf32>
    %c256 = arith.constant 256 : index
    %c0_9 = arith.constant 0 : index
    %12 = vector.load %arg7[%c256, %c0_9] : memref<496x1xf32, #tpu.memory_space<vmem>>, vector<128x1xf32>
    %13 = vector.broadcast %12 : vector<128x1xf32> to vector<128x256xf32>
    %14 = arith.addf %11, %13 : vector<128x256xf32>
    %cst_10 = arith.constant 0.000000e+00 : f32
    %15 = vector.broadcast %cst_10 : f32 to vector<128x256xf32>
    %16 = arith.maximumf %14, %15 : vector<128x256xf32>
    %17 = arith.truncf %16 : vector<128x256xf32> to vector<128x256xbf16>
    %c0_11 = arith.constant 0 : index
    %c0_12 = arith.constant 0 : index
    %18 = vector.load %arg4[%c0_11, %c0_12] : memref<64x128xbf16, #tpu.memory_space<vmem>>, vector<64x128xbf16>
    %cst_13 = arith.constant dense<0.000000e+00> : vector<64x256xf32>
    %19 = tpu.matmul %18, %17, %cst_13 {dimension_numbers = #tpu.dot_dimension_numbers<[1], [0], [0], [1], [0, 0, 1, 1], [], []>} : vector<64x128xbf16>, vector<128x256xbf16>, vector<64x256xf32> -> vector<64x256xf32>
    %c384 = arith.constant 384 : index
    %c0_14 = arith.constant 0 : index
    %20 = vector.load %arg7[%c384, %c0_14] : memref<496x1xf32, #tpu.memory_space<vmem>>, vector<64x1xf32>
    %21 = vector.broadcast %20 : vector<64x1xf32> to vector<64x256xf32>
    %22 = arith.addf %19, %21 : vector<64x256xf32>
    %cst_15 = arith.constant 0.000000e+00 : f32
    %23 = vector.broadcast %cst_15 : f32 to vector<64x256xf32>
    %24 = arith.maximumf %22, %23 : vector<64x256xf32>
    %25 = arith.truncf %24 : vector<64x256xf32> to vector<64x256xbf16>
    %c0_16 = arith.constant 0 : index
    %c0_17 = arith.constant 0 : index
    %26 = vector.load %arg5[%c0_16, %c0_17] : memref<32x64xbf16, #tpu.memory_space<vmem>>, vector<32x64xbf16>
    %cst_18 = arith.constant dense<0.000000e+00> : vector<32x256xf32>
    %27 = tpu.matmul %26, %25, %cst_18 {dimension_numbers = #tpu.dot_dimension_numbers<[1], [0], [0], [1], [0, 0, 1, 1], [], []>} : vector<32x64xbf16>, vector<64x256xbf16>, vector<32x256xf32> -> vector<32x256xf32>
    %c448 = arith.constant 448 : index
    %c0_19 = arith.constant 0 : index
    %28 = vector.load %arg7[%c448, %c0_19] : memref<496x1xf32, #tpu.memory_space<vmem>>, vector<32x1xf32>
    %29 = vector.broadcast %28 : vector<32x1xf32> to vector<32x256xf32>
    %30 = arith.addf %27, %29 : vector<32x256xf32>
    %cst_20 = arith.constant 0.000000e+00 : f32
    %31 = vector.broadcast %cst_20 : f32 to vector<32x256xf32>
    %32 = arith.maximumf %30, %31 : vector<32x256xf32>
    %33 = arith.truncf %32 : vector<32x256xf32> to vector<32x256xbf16>
    %c0_21 = arith.constant 0 : index
    %c0_22 = arith.constant 0 : index
    %34 = vector.load %arg6[%c0_21, %c0_22] : memref<9x32xbf16, #tpu.memory_space<vmem>>, vector<9x32xbf16>
    %cst_23 = arith.constant dense<0.000000e+00> : vector<9x256xf32>
    %35 = tpu.matmul %34, %33, %cst_23 {dimension_numbers = #tpu.dot_dimension_numbers<[1], [0], [0], [1], [0, 0, 1, 1], [], []>} : vector<9x32xbf16>, vector<32x256xbf16>, vector<9x256xf32> -> vector<9x256xf32>
    %c480 = arith.constant 480 : index
    %c0_24 = arith.constant 0 : index
    %36 = vector.load %arg7[%c480, %c0_24] : memref<496x1xf32, #tpu.memory_space<vmem>>, vector<9x1xf32>
    %37 = vector.broadcast %36 : vector<9x1xf32> to vector<9x256xf32>
    %38 = arith.addf %35, %37 : vector<9x256xf32>
    %c0_25 = arith.constant 0 : index
    %c0_26 = arith.constant 0 : index
    %39 = vector.load %arg8[%c0_25, %c0_26] : memref<9x256xf32, #tpu.memory_space<vmem>>, vector<9x256xf32>
    tpu.vector_store %arg8[%c0_25, %c0_26], %38 {strides = array<i32>} : memref<9x256xf32, #tpu.memory_space<vmem>>, vector<9x256xf32>,
    return
  }
  func.func @transform_0(%arg0: i32) -> (i32, i32) {
    %c0_i32 = arith.constant 0 : i32
    %c0_i32_0 = arith.constant 0 : i32
    return %arg0, %c0_i32 : i32, i32
  }
  func.func @transform_1(%arg0: i32) -> (i32, i32) {
    %c0_i32 = arith.constant 0 : i32
    %c0_i32_0 = arith.constant 0 : i32
    %c0_i32_1 = arith.constant 0 : i32
    return %c0_i32, %c0_i32_0 : i32, i32
  }
  func.func @transform_2(%arg0: i32) -> (i32, i32) {
    %c0_i32 = arith.constant 0 : i32
    %c0_i32_0 = arith.constant 0 : i32
    %c0_i32_1 = arith.constant 0 : i32
    return %c0_i32, %c0_i32_0 : i32, i32
  }
  func.func @transform_3(%arg0: i32) -> (i32, i32) {
    %c0_i32 = arith.constant 0 : i32
    %c0_i32_0 = arith.constant 0 : i32
    %c0_i32_1 = arith.constant 0 : i32
    return %c0_i32, %c0_i32_0 : i32, i32
  }
  func.func @transform_4(%arg0: i32) -> (i32, i32) {
    %c0_i32 = arith.constant 0 : i32
    %c0_i32_0 = arith.constant 0 : i32
    %c0_i32_1 = arith.constant 0 : i32
    return %c0_i32, %c0_i32_0 : i32, i32
  }
  func.func @transform_5(%arg0: i32) -> (i32, i32) {
    %c0_i32 = arith.constant 0 : i32
    %c0_i32_0 = arith.constant 0 : i32
    %c0_i32_1 = arith.constant 0 : i32
    return %c0_i32, %c0_i32_0 : i32, i32
  }
  func.func @transform_6(%arg0: i32) -> (i32, i32) {
    %c0_i32 = arith.constant 0 : i32
    %c0_i32_0 = arith.constant 0 : i32
    %c0_i32_1 = arith.constant 0 : i32
    return %c0_i32, %c0_i32_0 : i32, i32
  }
  func.func @transform_7(%arg0: i32) -> (i32, i32) {
    %c0_i32 = arith.constant 0 : i32
    %c0_i32_0 = arith.constant 0 : i32
    return %c0_i32, %arg0 : i32, i32
  }
}

</mosaic_0001>

<bundles_post_ra>
// kernel: tpu_custom_call.1
= control target key start
LH: loop header
LB: loop body
LE: loop exit
PB: predicated region body
PF: predicated region fallthrough
CT: control target
= control target key end

     0   :  { %12 = vsyncpa [#allocation3], 0  ;;  %s2633_s0 = inlined_call_operand.vmem [shape: f32[512,9], index: 0, kind: input, shape index: {}]   ;;  %s2634_s1 = inlined_call_operand.vmem [shape: bf16[256,9], index: 1, kind: input, shape index: {}]   ;;  %s2635_s2 = inlined_call_operand.vmem [shape: bf16[128,256], index: 2, kind: input, shape index: {}]   ;;  %s2636_s3 = inlined_call_operand.vmem [shape: bf16[64,128], index: 3, kind: input, shape index: {}]   ;;  %s2637_s4 = inlined_call_operand.vmem [shape: bf16[32,64], index: 4, kind: input, shape index: {}]   ;;  %s2638_s5 = inlined_call_operand.vmem [shape: bf16[9,32], index: 5, kind: input, shape index: {}]   ;;  %s2639_s6 = inlined_call_operand.vmem [shape: f32[496,1], index: 6, kind: input, shape index: {}]   ;;  %s2640_s7 = inlined_call_operand.hbm [shape: f32[9,512], index: 7, kind: output, shape index: {}]  }
   0x1   :  { %14 = vsyncpa [#allocation3 + $0x1], 0  ;;  %s2133_s24 = smov 0   ;;  %s2135_s25 = smov 0  }
   0x2   :  { %s2137_s26 = smov 0   ;;  %s2139_s27 = smov 0  }
   0x3 LB: > { %s2154_s28 = sadd.s32 4294967295, %s2086_s27   ;;  %s1805_s29 = sadd.s32 4294967294, %s2086_s27   ;;  %s2086_s27 = sphi %s2139_s27, %s2646_s27   ;;  %s2082_s26 = sphi %s2137_s26, %s2645_s26   ;;  %s2078_s25 = sphi %s2135_s25, %s2644_s25   ;;  %s2074_s24 = sphi %s2133_s24, %s2643_s24  }
   0x4   : > { %s2158_s30 = sadd.s32 1, %s2086_s27   ;;  %s179_s8 = sadd.s32 1, %s2082_s26 }
   0x5   : > { %s176_s9 = ssub.s32 %s2086_s27, %s2158_s30  ;;  %p189_p0 = scmp.ne.s32.totalorder %s2082_s26, %s2078_s25 }
   0x6   : > { %p177_p1 = scmp.eq.s32.totalorder %s176_s9, 0  ;;  %p190_p2 = scmp.eq.s32.totalorder %s2154_s28, 1 }
   0x7   : > { %p195_p3 = scmp.ne.s32.totalorder %s2078_s25, %s2074_s24  ;;  %p196_p4 = scmp.eq.s32.totalorder %s1805_s29, 1 }
   0x8   : > { %s2169_s10 = scalar_select %p177_p1, %s2082_s26, %s179_s8  }
   0x9   : > { %p2171_p5 = por %p190_p2, %p189_p0  ;;  %p2175_p6 = por %p196_p4, %p195_p3 }
   0xa   : > { %p1808_p7 = scmp.ge.s32.totalorder %s2086_s27, 1  ;;  %p241_p8 = scmp.lt.s32.totalorder %s2086_s27, 3 }
   0xc   : > { %p242_p9 = pnand %p1808_p7, %p241_p8 }
   0xd   : > { %s1810_s13 = sshll.u32 (!%p242_p9), %s2154_s28, 5  ;;  %v2185_v0 = vld [vmem:[%s2634_s1] sm:$0xff] (!%p242_p9)   ;;  %vm633_vm0 = vcmask (!%p242_p9), 72704   ;;  %v2088_v1 = vmov (!%p242_p9), 0   ;;  %v363_v3 = vld [vmem:[%s2639_s6 + $0x10] sm:$0xff] (!%p242_p9)  ;;  %v362_v4 = vld [vmem:[%s2639_s6 + $0x8] sm:$0xff] (!%p242_p9) }
   0xe   : > { %245 = sbr.rel (%p242_p9) target bundleno = 1433 (0x599), region = 48  ;;  %p274_p10 = scmp.lt.s32.totalorder (!%p242_p9), %s1810_s13, 63  ;;  %1892 = vmatprep.mubr.msk.bf16.mxu0 (!%p242_p9), %vm633_vm0, %v2185_v0  ;;  %1975 = vset.pattern.permute.xlu0 (!%p242_p9), %v2088_v1  ;;  %v361_v2 = vld [vmem:[%s2639_s6] sm:$0xff] (!%p242_p9)  ;;  %v364_v5 = vld [vmem:[%s2639_s6 + $0x18] sm:$0xff] (!%p242_p9)  ;;  %v366_v24 = vld [vmem:[%s2639_s6 + $0x28] sm:$0xff] (!%p242_p9)  ;;  %vm1587_vm1 = vcmask (!%p242_p9), 523264  }
   0xf   : > { %395 = vperm.xlu0 (!%p242_p9), %1975, %v361_v2   ;;  %1976 = vset.pattern.permute.xlu1 (!%p242_p9), %v2088_v1  ;;  %v365_v15 = vld [vmem:[%s2639_s6 + $0x20] sm:$0xff] (!%p242_p9)  ;;  %v367_v27 = vld [vmem:[%s2639_s6 + $0x30] sm:$0xff] (!%p242_p9)  ;;  %v368_v28 = vld [vmem:[%s2639_s6 + $0x38] sm:$0xff] (!%p242_p9)  ;;  %vm1678_vm2 = vcmask (!%p242_p9), 261120   ;;  %s1875_s17 = sshll.u32 (!%p242_p9), %s2154_s28, 8  ;;  %s2089_s22 = smov (!%p242_p9), [#allocation2]  }
  0x10   : > { %405 = vperm.xlu1 (!%p242_p9), %1976, %v363_v3   ;;  %v369_v29 = vld [vmem:[%s2639_s6 + $0x40] sm:$0xff] (!%p242_p9)  ;;  %v370_v33 = vld [vmem:[%s2639_s6 + $0x48] sm:$0xff] (!%p242_p9)  ;;  %v371_v34 = vld [vmem:[%s2639_s6 + $0x50] sm:$0xff] (!%p242_p9)  ;;  %s2028_s23 = sshll.u32 (!%p242_p9), %s2089_s22, 4  ;;  %s2029_s23 = int_to_ptr.vmem [resolvable:$false] %s2028_s23 }
  0x11   : > { %v372_v39 = vld [vmem:[%s2639_s6 + $0x58] sm:$0xff] (!%p242_p9)  ;;  %v373_v40 = vld [vmem:[%s2639_s6 + $0x60] sm:$0xff] (!%p242_p9)  ;;  %v374_v44 = vld [vmem:[%s2639_s6 + $0x68] sm:$0xff] (!%p242_p9)  ;;  %s2030_s29 = scalar_lea.vmem (!%p242_p9), %s2029_s23, 1024 }
  0x12   : > { %v375_v46 = vld [vmem:[%s2639_s6 + $0x70] sm:$0xff] (!%p242_p9)  ;;  %v376_v50 = vld [vmem:[%s2639_s6 + $0x78] sm:$0xff] (!%p242_p9)  ;;  %v377_v55 = vld [vmem:[%s2639_s6 + $0x80] sm:$0xff] (!%p242_p9) }
  0x13   : > { %400 = vperm.xlu0 (!%p242_p9), %1975, %v362_v4   ;;  %v378_v57 = vld [vmem:[%s2639_s6 + $0x88] sm:$0xff] (!%p242_p9)  ;;  %v379_v58 = vld [vmem:[%s2639_s6 + $0x90] sm:$0xff] (!%p242_p9)  ;;  %v380_v62 = vld [vmem:[%s2639_s6 + $0x98] sm:$0xff] (!%p242_p9) }
  0x14   : > { %410 = vperm.xlu1 (!%p242_p9), %1976, %v364_v5   ;;  %v381_v3 = vld [vmem:[%s2639_s6 + $0xa0] sm:$0xff] (!%p242_p9)  ;;  %v382_v5 = vld [vmem:[%s2639_s6 + $0xa8] sm:$0xff] (!%p242_p9) }
  0x15   : > { %s2648_s13 = smov (!%p274_p10, %s1810_s13), 63 }
  0x16   : > { %s1811_s20 = sshll.u32 %s2648_s13, 3 }
  0x17   : > { %s2203_s8 = scalar_lea.vmem %s2633_s0, %s1811_s20  ;;  %415 = vperm.xlu0 %1975, %v365_v15   ;;  %v386_v15 = vld [vmem:[%s2639_s6 + $0xc8] sm:$0xff]  ;;  %s2590_s20 = scalar_lea.hbm %s2640_s7, %s1875_s17 }
  0x18   : > { %v297_v6 = vld [vmem:[%s2203_s8 + $0x80] sm:$0xff]  ;;  %v298_v7 = vld [vmem:[%s2203_s8 + $0x88] sm:$0xff]  ;;  %v299_v11 = vld [vmem:[%s2203_s8 + $0x90] sm:$0xff]  ;;  %420 = vperm.xlu1 %1976, %v366_v24  }
  0x19   : > { %v281_v8 = vld [vmem:[%s2203_s8] sm:$0xff]  ;;  %v321_v9 = vpack.c.bf16 %v298_v7, %v297_v6  ;;  %v282_v10 = vld [vmem:[%s2203_s8 + $0x8] sm:$0xff]  ;;  %v300_v12 = vld [vmem:[%s2203_s8 + $0x98] sm:$0xff] }
  0x1a   : > { %v313_v13 = vpack.c.bf16 %v282_v10, %v281_v8  ;;  %v322_v14 = vpack.c.bf16 %v300_v12, %v299_v11  ;;  %v283_v16 = vld [vmem:[%s2203_s8 + $0x10] sm:$0xff]  ;;  %v284_v17 = vld [vmem:[%s2203_s8 + $0x18] sm:$0xff]  ;;  %v301_v20 = vld [vmem:[%s2203_s8 + $0xa0] sm:$0xff] }
  0x1b   : > { %1924 = vmatprep.subr.msk.bf16.mxu0 %vm633_vm0, %v321_v9  ;;  %v314_v19 = vpack.c.bf16 %v284_v17, %v283_v16  ;;  %v302_v21 = vld [vmem:[%s2203_s8 + $0xa8] sm:$0xff]  ;;  %v285_v25 = vld [vmem:[%s2203_s8 + $0x20] sm:$0xff]  ;;  %425 = vperm.xlu0 %1975, %v367_v27   ;;  %v303_v31 = vld [vmem:[%s2203_s8 + $0xb0] sm:$0xff] }
  0x1c   : > { %v683_v18 = vsel %vm633_vm0, %v313_v13, 0  ;;  %v323_v23 = vpack.c.bf16 %v302_v21, %v301_v20  ;;  %v286_v26 = vld [vmem:[%s2203_s8 + $0x28] sm:$0xff]  ;;  %v304_v32 = vld [vmem:[%s2203_s8 + $0xb8] sm:$0xff]  ;;  %430 = vperm.xlu1 %1976, %v368_v28   ;;  %v287_v37 = vld [vmem:[%s2203_s8 + $0x30] sm:$0xff] }
  0x1d   : > { %1877 = vmatpush3.bf16.xpose.msra.mxu0 %v683_v18  ;;  %v686_v22 = vsel %vm633_vm0, %v314_v19, 0  ;;  %v315_v30 = vpack.c.bf16 %v286_v26, %v285_v25  ;;  %v324_v36 = vpack.c.bf16 %v304_v32, %v303_v31  ;;  %v288_v38 = vld [vmem:[%s2203_s8 + $0x38] sm:$0xff]  ;;  %v305_v42 = vld [vmem:[%s2203_s8 + $0xc0] sm:$0xff]  ;;  %v306_v43 = vld [vmem:[%s2203_s8 + $0xc8] sm:$0xff] }
  0x1e   : > { %1925 = vmatprep.subr.msk.bf16.mxu0 %vm633_vm0, %v322_v14  ;;  %v316_v41 = vpack.c.bf16 %v288_v38, %v287_v37  ;;  %v289_v45 = vld [vmem:[%s2203_s8 + $0x40] sm:$0xff]  ;;  %v325_v48 = vpack.c.bf16 %v306_v43, %v305_v42  ;;  %v290_v49 = vld [vmem:[%s2203_s8 + $0x48] sm:$0xff]  ;;  %v307_v51 = vld [vmem:[%s2203_s8 + $0xd0] sm:$0xff] }
  0x1f   : > { %435 = vperm.xlu0 %1975, %v369_v29   ;;  %v689_v35 = vsel %vm633_vm0, %v315_v30, 0  ;;  %v308_v52 = vld [vmem:[%s2203_s8 + $0xd8] sm:$0xff]  ;;  %v291_v53 = vld [vmem:[%s2203_s8 + $0x50] sm:$0xff]  ;;  %v317_v56 = vpack.c.bf16 %v290_v49, %v289_v45  ;;  %v309_v63 = vld [vmem:[%s2203_s8 + $0xe0] sm:$0xff] }
  0x20   : > { %440 = vperm.xlu1 %1976, %v370_v33   ;;  %v692_v47 = vsel %vm633_vm0, %v316_v41, 0  ;;  %v292_v54 = vld [vmem:[%s2203_s8 + $0x58] sm:$0xff]  ;;  %v326_v60 = vpack.c.bf16 %v308_v52, %v307_v51  ;;  %v310_v2 = vld [vmem:[%s2203_s8 + $0xe8] sm:$0xff]  ;;  %v383_v6 = vld [vmem:[%s2639_s6 + $0xb0] sm:$0xff] }
  0x21   : > { %v695_v59 = vsel %vm633_vm0, %v317_v56, 0  ;;  %v318_v61 = vpack.c.bf16 %v292_v54, %v291_v53  ;;  %v327_v7 = vpack.c.bf16 %v310_v2, %v309_v63  ;;  %v293_v8 = vld [vmem:[%s2203_s8 + $0x60] sm:$0xff]  ;;  %v294_v9 = vld [vmem:[%s2203_s8 + $0x68] sm:$0xff]  ;;  %v384_v10 = vld [vmem:[%s2639_s6 + $0xb8] sm:$0xff] }
  0x22   : > { %v385_v11 = vld [vmem:[%s2639_s6 + $0xc0] sm:$0xff]  ;;  %v319_v12 = vpack.c.bf16 %v294_v9, %v293_v8  ;;  %v311_v13 = vld [vmem:[%s2203_s8 + $0xf0] sm:$0xff]  ;;  %v312_v14 = vld [vmem:[%s2203_s8 + $0xf8] sm:$0xff] }
  0x23   : > { %445 = vperm.xlu0 %1975, %v371_v34   ;;  %v698_v4 = vsel %vm633_vm0, %v318_v61, 0  ;;  %v387_v16 = vld [vmem:[%s2639_s6 + $0xd0] sm:$0xff]  ;;  %v328_v18 = vpack.c.bf16 %v312_v14, %v311_v13  ;;  %v296_v20 = vld [vmem:[%s2203_s8 + $0x78] sm:$0xff]  ;;  %v390_v24 = vld [vmem:[%s2639_s6 + $0xe8] sm:$0xff] }
  0x24   : > { %450 = vperm.xlu1 %1976, %v372_v39   ;;  %v701_v17 = vsel %vm633_vm0, %v319_v12, 0  ;;  %v295_v19 = vld [vmem:[%s2203_s8 + $0x70] sm:$0xff]  ;;  %v388_v21 = vld [vmem:[%s2639_s6 + $0xd8] sm:$0xff]  ;;  %v1035_v28 = vld [vmem:[%s2639_s6 + $0x100] sm:$0xff]  ;;  %s270_s8 = sand.u32 1, %s2078_s25  }
  0x25   : > { %1879 = vmatpush3.bf16.xpose.msra.mxu0 %v686_v22  ;;  %v389_v22 = vld [vmem:[%s2639_s6 + $0xe0] sm:$0xff]  ;;  %v391_v25 = vld [vmem:[%s2639_s6 + $0xf0] sm:$0xff]  ;;  %v392_v27 = vld [vmem:[%s2639_s6 + $0xf8] sm:$0xff]  ;;  %s1809_s13 = sshll.u32 %s270_s8, 5  ;;  %s2592_s28 = scalar_lea.sflag [#allocation3], %s270_s8 }
  0x26   : > { %1926 = vmatprep.subr.msk.bf16.mxu0 %vm633_vm0, %v323_v23  ;;  %v320_v23 = vpack.c.bf16 %v296_v20, %v295_v19  ;;  %v1036_v29 = vld [vmem:[%s2639_s6 + $0x108] sm:$0xff]  ;;  %v1037_v31 = vld [vmem:[%s2639_s6 + $0x110] sm:$0xff]  ;;  %v1038_v32 = vld [vmem:[%s2639_s6 + $0x118] sm:$0xff]  ;;  %s272_s15 = scalar_lea.vmem [#allocation2], %s1809_s13 }
  0x27   : > { %455 = vperm.xlu0 %1975, %v373_v40   ;;  %v1978_v30 = vld [vmem:[%s2634_s1 + $0x8] sm:$0xff]   ;;  %v1039_v33 = vld [vmem:[%s2639_s6 + $0x120] sm:$0xff]  ;;  %v1980_v39 = vld [vmem:[%s2634_s1 + $0x18] sm:$0xff]   ;;  %s1743_s16 = sshll.u32 %s272_s15, 4  ;;  %s2585_s16 = int_to_ptr.vmem [resolvable:$true] %s1743_s16 }
  0x28   : > { %460 = vperm.xlu1 %1976, %v374_v44   ;;  %v704_v26 = vsel %vm633_vm0, %v320_v23, 0  ;;  %v1040_v34 = vld [vmem:[%s2639_s6 + $0x128] sm:$0xff]  ;;  %v1043_v37 = vld [vmem:[%s2639_s6 + $0x140] sm:$0xff]  ;;  %v1045_v40 = vld [vmem:[%s2639_s6 + $0x150] sm:$0xff]  ;;  %s2024_s21 = scalar_lea.vmem %s2585_s16, 512  ;;  %p2031_p0 = scmp.lt.s32.totalorder %s2585_s16, %s2029_s23 }
  0x29   : > { %v1044_v38 = vld [vmem:[%s2639_s6 + $0x148] sm:$0xff]  ;;  %v1046_v41 = vld [vmem:[%s2639_s6 + $0x158] sm:$0xff]  ;;  %v1047_v42 = vld [vmem:[%s2639_s6 + $0x160] sm:$0xff]  ;;  %p2025_p11 = scmp.ne.s32.totalorder %s2585_s16, %s2024_s21  ;;  %p2032_p1 = scmp.lt.s32.totalorder %s2030_s29, %s2024_s21 }
  0x2a   : > { %v1048_v43 = vld [vmem:[%s2639_s6 + $0x168] sm:$0xff]  ;;  %v1981_v44 = vld [vmem:[%s2634_s1 + $0x20] sm:$0xff]   ;;  %v1049_v45 = vld [vmem:[%s2639_s6 + $0x170] sm:$0xff] }
  0x2b   : > { %465 = vperm.xlu0 %1975, %v375_v46   ;;  %v1050_v46 = vld [vmem:[%s2639_s6 + $0x178] sm:$0xff]  ;;  %v1982_v49 = vld [vmem:[%s2634_s1 + $0x28] sm:$0xff]   ;;  %v1384_v52 = vld [vmem:[%s2639_s6 + $0x1a0] sm:$0xff]  ;;  %p2026_p12 = pnand %p2025_p11, %p2171_p5  ;;  %p2033_p2 = por %p2032_p1, %p2031_p0 }
  0x2c   : > { %470 = vperm.xlu1 %1976, %v376_v50   ;;  %v1382_v50 = vld [vmem:[%s2639_s6 + $0x190] sm:$0xff]  ;;  %v1383_v51 = vld [vmem:[%s2639_s6 + $0x198] sm:$0xff]  ;;  %v1385_v53 = vld [vmem:[%s2639_s6 + $0x1a8] sm:$0xff] }
  0x2d   : > { %1881 = vmatpush3.bf16.xpose.msra.mxu0 %v689_v35  ;;  %v1041_v35 = vld [vmem:[%s2639_s6 + $0x130] sm:$0xff]  ;;  %v1387_v56 = vld [vmem:[%s2639_s6 + $0x1b8] sm:$0xff]  ;;  %v1662_v63 = vld [vmem:[%s2639_s6 + $0x1e8] sm:$0x1]  ;;  %p2027_p13 = pneg %p2026_p12 }
  0x2e   : > { %1927 = vmatprep.subr.msk.bf16.mxu0 %vm633_vm0, %v324_v36  ;;  %v1042_v36 = vld [vmem:[%s2639_s6 + $0x138] sm:$0xff]  ;;  %v1983_v54 = vld [vmem:[%s2634_s1 + $0x30] sm:$0xff]   ;;  %v1985_v2 = vld [vmem:[%s2634_s1 + $0x40] sm:$0xff]  }
  0x2f   : > { %475 = vperm.xlu0 %1975, %v377_v55   ;;  %v1386_v55 = vld [vmem:[%s2639_s6 + $0x1b0] sm:$0xff]  ;;  %v1556_v61 = vld [vmem:[%s2639_s6 + $0x1d8] sm:$0xff]  ;;  %v1995_v19 = vld [vmem:[%s2635_s2 + $0x4] ss:$8 sps:$4 sm:$0xff]   ;;  %p2034_p3 = pnand %p2033_p2, %p2027_p13 }
  0x30   : > { %480 = vperm.xlu1 %1976, %v378_v57   ;;  %v1553_v57 = vld [vmem:[%s2639_s6 + $0x1c0] sm:$0xff]  ;;  %v1991_v8 = vld [vmem:[%s2634_s1 + $0x70] sm:$0xff]   ;;  %v1992_v9 = vld [vmem:[%s2634_s1 + $0x78] sm:$0xff]   ;;  %1243 = vmatprep.mubr.bf16.mxu1 %v1995_v19 }
  0x33   : > { %485 = vperm.xlu0 %1975, %v379_v58   ;;  %v1554_v58 = vld [vmem:[%s2639_s6 + $0x1c8] sm:$0xff] }
  0x34   : > { %490 = vperm.xlu1 %1976, %v380_v62   ;;  %v1661_v62 = vld [vmem:[%s2639_s6 + $0x1e0] sm:$0xff] }
  0x35   : > { %1883 = vmatpush3.bf16.xpose.msra.mxu0 %v692_v47  ;;  %v1380_v47 = vld [vmem:[%s2639_s6 + $0x180] sm:$0xff] }
  0x36   : > { %1928 = vmatprep.subr.msk.bf16.mxu0 %vm633_vm0, %v325_v48  ;;  %v1381_v48 = vld [vmem:[%s2639_s6 + $0x188] sm:$0xff] }
  0x37   : > { %495 = vperm.xlu0 %1975, %v381_v3   ;;  %v1986_v3 = vld [vmem:[%s2634_s1 + $0x48] sm:$0xff]  }
  0x38   : > { %500 = vperm.xlu1 %1976, %v382_v5   ;;  %v1988_v5 = vld [vmem:[%s2634_s1 + $0x58] sm:$0xff]  }
  0x3b   : > { %505 = vperm.xlu0 %1975, %v383_v6   ;;  %v1989_v6 = vld [vmem:[%s2634_s1 + $0x60] sm:$0xff]  }
  0x3c   : > { %510 = vperm.xlu1 %1976, %v384_v10  }
  0x3d   : > { %1885 = vmatpush3.bf16.xpose.msra.mxu0 %v695_v59  ;;  %v1984_v59 = vld [vmem:[%s2634_s1 + $0x38] sm:$0xff]  }
  0x3e   : > { %1929 = vmatprep.subr.msk.bf16.mxu0 %vm633_vm0, %v326_v60  ;;  %v1555_v60 = vld [vmem:[%s2639_s6 + $0x1d0] sm:$0xff] }
  0x3f   : > { %515 = vperm.xlu0 %1975, %v385_v11  }
  0x40   : > { %520 = vperm.xlu1 %1976, %v386_v15  }
  0x43   : > { %525 = vperm.xlu0 %1975, %v387_v16  }
  0x44   : > { %530 = vperm.xlu1 %1976, %v388_v21  }
  0x45   : > { %1887 = vmatpush3.bf16.xpose.msra.mxu0 %v698_v4  ;;  %v1987_v4 = vld [vmem:[%s2634_s1 + $0x50] sm:$0xff]  }
  0x46   : > { %1930 = vmatprep.subr.msk.bf16.mxu0 %vm633_vm0, %v327_v7  ;;  %v1990_v7 = vld [vmem:[%s2634_s1 + $0x68] sm:$0xff]  }
  0x47   : > { %535 = vperm.xlu0 %1975, %v389_v22  }
  0x48   : > { %540 = vperm.xlu1 %1976, %v390_v24  }
  0x4b   : > { %545 = vperm.xlu0 %1975, %v391_v25  }
  0x4c   : > { %550 = vperm.xlu1 %1976, %v392_v27  }
  0x4d   : > { %1889 = vmatpush3.bf16.xpose.msra.mxu0 %v701_v17 }
  0x4e   : > { %1931 = vmatprep.subr.msk.bf16.mxu0 %vm633_vm0, %v328_v18 }
  0x4f   : > { %1053 = vperm.xlu0 %1975, %v1035_v28  }
  0x50   : > { %1058 = vperm.xlu1 %1976, %v1036_v29  }
  0x53   : > { %1063 = vperm.xlu0 %1975, %v1037_v31  }
  0x54   : > { %1068 = vperm.xlu1 %1976, %v1038_v32  }
  0x55   : > { %1891 = vmatpush3.bf16.xpose.msra.mxu0 %v704_v26 }
  0x57   : > { %1073 = vperm.xlu0 %1975, %v1039_v33  }
  0x58   : > { %1078 = vperm.xlu1 %1976, %v1040_v34  }
  0x5b   : > { %1083 = vperm.xlu0 %1975, %v1041_v35  }
  0x5c   : > { %1893 = vmatmul.mubr.msk.bf16.vlgmr.msra.gmra.mrb[0].mxu0 %vm633_vm0, %v2185_v0  ;;  %v1979_v0 = vld [vmem:[%s2634_s1 + $0x10] sm:$0xff]   ;;  %1088 = vperm.xlu1 %1976, %v1042_v36  }
  0x5d   : > { %1894 = vmatprep.mubr.msk.bf16.mxu0 %vm633_vm0, %v1978_v30 }
  0x5f   : > { %1093 = vperm.xlu0 %1975, %v1043_v37  }
  0x60   : > { %1098 = vperm.xlu1 %1976, %v1044_v38  }
  0x63   : > { %1103 = vperm.xlu0 %1975, %v1045_v40  }
  0x64   : > { %1895 = vmatmul.mubr.msk.bf16.gmra.mrb[4].mxu0 %vm633_vm0, %v1978_v30  ;;  %1108 = vperm.xlu1 %1976, %v1046_v41  }
  0x65   : > { %1896 = vmatprep.mubr.msk.bf16.mxu0 %vm633_vm0, %v1979_v0 }
  0x67   : > { %1113 = vperm.xlu0 %1975, %v1047_v42  }
  0x68   : > { %1118 = vperm.xlu1 %1976, %v1048_v43  }
  0x6b   : > { %1123 = vperm.xlu0 %1975, %v1049_v45  }
  0x6c   : > { %1897 = vmatmul.mubr.msk.bf16.gmra.mrb[8].mxu0 %vm633_vm0, %v1979_v0  ;;  %1128 = vperm.xlu1 %1976, %v1050_v46  }
  0x6d   : > { %1898 = vmatprep.mubr.msk.bf16.mxu0 %vm633_vm0, %v1980_v39 }
  0x6f   : > { %1390 = vperm.xlu0 %1975, %v1380_v47  }
  0x70   : > { %1395 = vperm.xlu1 %1976, %v1381_v48  }
  0x73   : > { %1400 = vperm.xlu0 %1975, %v1382_v50  }
  0x74   : > { %1899 = vmatmul.mubr.msk.bf16.gmra.mrb[12].mxu0 %vm633_vm0, %v1980_v39  ;;  %1405 = vperm.xlu1 %1976, %v1383_v51  }
  0x75   : > { %1900 = vmatprep.mubr.msk.bf16.mxu0 %vm633_vm0, %v1981_v44 }
  0x77   : > { %1410 = vperm.xlu0 %1975, %v1384_v52  }
  0x78   : > { %1415 = vperm.xlu1 %1976, %v1385_v53  }
  0x7b   : > { %1420 = vperm.xlu0 %1975, %v1386_v55  }
  0x7c   : > { %1901 = vmatmul.mubr.msk.bf16.gmra.mrb[16].mxu0 %vm633_vm0, %v1981_v44  ;;  %1425 = vperm.xlu1 %1976, %v1387_v56  }
  0x7d   : > { %1902 = vmatprep.mubr.msk.bf16.mxu0 %vm633_vm0, %v1982_v49 }
  0x7f   : > { %1559 = vperm.xlu0 %1975, %v1553_v57  }
  0x80   : > { %1564 = vperm.xlu1 %1976, %v1554_v58  }
  0x83   : > { %1569 = vperm.xlu0 %1975, %v1555_v60  }
  0x84   : > { %1903 = vmatmul.mubr.msk.bf16.gmra.mrb[20].mxu0 %vm633_vm0, %v1982_v49  ;;  %1574 = vperm.xlu1 %1976, %v1556_v61  }
  0x85   : > { %1904 = vmatprep.mubr.msk.bf16.mxu0 %vm633_vm0, %v1983_v54 }
  0x87   : > { %1665 = vperm.xlu0 %1975, %v1661_v62  }
  0x88   : > { %1670 = vperm.xlu1 %1976, %v1662_v63  }
  0x8c   : > { %1905 = vmatmul.mubr.msk.bf16.gmra.mrb[24].mxu0 %vm633_vm0, %v1983_v54 }
  0x8d   : > { %1906 = vmatprep.mubr.msk.bf16.mxu0 %vm633_vm0, %v1984_v59 }
  0x8e   : > { %v396_v10 = vpop.permute.xlu0 %395 }
  0x8f   : > { %v406_v20 = vpop.permute.xlu1 %405 }
  0x92   : > { %v401_v14 = vpop.permute.xlu0 %400 }
  0x93   : > { %v411_v31 = vpop.permute.xlu1 %410 }
  0x94   : > { %1907 = vmatmul.mubr.msk.bf16.gmra.mrb[28].mxu0 %vm633_vm0, %v1984_v59 }
  0x95   : > { %1908 = vmatprep.mubr.msk.bf16.mxu0 %vm633_vm0, %v1985_v2 }
  0x96   : > { %v416_v41 = vpop.permute.xlu0 %415 }
  0x97   : > { %v421_v46 = vpop.permute.xlu1 %420 }
  0x9a   : > { %v426_v57 = vpop.permute.xlu0 %425 }
  0x9b   : > { %v431_v62 = vpop.permute.xlu1 %430 }
  0x9c   : > { %1909 = vmatmul.mubr.msk.bf16.gmra.mrb[32].mxu0 %vm633_vm0, %v1985_v2 }
  0x9d   : > { %1910 = vmatprep.mubr.msk.bf16.mxu0 %vm633_vm0, %v1986_v3 }
  0xa4   : > { %1911 = vmatmul.mubr.msk.bf16.gmra.mrb[36].mxu0 %vm633_vm0, %v1986_v3 }
  0xa5   : > { %1912 = vmatprep.mubr.msk.bf16.mxu0 %vm633_vm0, %v1987_v4 }
  0xac   : > { %1913 = vmatmul.mubr.msk.bf16.gmra.mrb[40].mxu0 %vm633_vm0, %v1987_v4 }
  0xad   : > { %1914 = vmatprep.mubr.msk.bf16.mxu0 %vm633_vm0, %v1988_v5 }
  0xb4   : > { %1915 = vmatmul.mubr.msk.bf16.gmra.mrb[44].mxu0 %vm633_vm0, %v1988_v5 }
  0xb5   : > { %1916 = vmatprep.mubr.msk.bf16.mxu0 %vm633_vm0, %v1989_v6 }
  0xbc   : > { %1917 = vmatmul.mubr.msk.bf16.gmra.mrb[48].mxu0 %vm633_vm0, %v1989_v6 }
  0xbd   : > { %1918 = vmatprep.mubr.msk.bf16.mxu0 %vm633_vm0, %v1990_v7 }
  0xc4   : > { %1919 = vmatmul.mubr.msk.bf16.gmra.mrb[52].mxu0 %vm633_vm0, %v1990_v7 }
  0xc5   : > { %1920 = vmatprep.mubr.msk.bf16.mxu0 %vm633_vm0, %v1991_v8 }
  0xcc   : > { %1921 = vmatmul.mubr.msk.bf16.gmra.mrb[56].mxu0 %vm633_vm0, %v1991_v8 }
  0xcd   : > { %1922 = vmatprep.mubr.msk.bf16.mxu0 %vm633_vm0, %v1992_v9 }
  0xd4   : > { %1923 = vmatmul.mubr.msk.bf16.gmra.mrb[60].mxu0 %vm633_vm0, %v1992_v9 }
 0x12f   : > { %v764_v11 = vpop.f32.mrb[0].mxu0 }
 0x130   : > { %v765_v12 = vadd.f32 %v764_v11, %v396_v10  ;;  %v766_v13 = vpop.f32.mrb[1].mxu0  ;;  %v436_v11 = vpop.permute.xlu0 %435 }
 0x131   : > { %v767_v15 = vadd.f32 %v766_v13, %v396_v10  ;;  %v768_v16 = vpop.f32.mrb[2].mxu0 }
 0x132   : > { %v769_v17 = vadd.f32 %v768_v16, %v401_v14  ;;  %v770_v18 = vpop.f32.mrb[3].mxu0  ;;  %v923_v22 = vmax.f32 %v765_v12, 0.0  ;;  %v441_v16 = vpop.permute.xlu1 %440 }
 0x133   : > { %v771_v21 = vadd.f32 %v770_v18, %v401_v14  ;;  %v924_v24 = vmax.f32 %v767_v15, 0.0 }
 0x134   : > { %v925_v23 = vmax.f32 %v769_v17, 0.0 }
 0x135   : > { %v926_v25 = vmax.f32 %v771_v21, 0.0 }
 0x136   : > { %v987_v26 = vpack.c.bf16 %v925_v23, %v923_v22 }
 0x137   : > { %v774_v27 = vpop.f32.mrb[4].mxu0  ;;  %v988_v28 = vpack.c.bf16 %v926_v25, %v924_v24 }
 0x138   : > { %v775_v29 = vadd.f32 %v774_v27, %v406_v20  ;;  %v776_v30 = vpop.f32.mrb[5].mxu0  ;;  %v446_v27 = vpop.permute.xlu0 %445 }
 0x139   : > { %v777_v32 = vadd.f32 %v776_v30, %v406_v20  ;;  %v778_v33 = vpop.f32.mrb[6].mxu0  ;;  %1211 = vmatprep.subr.bf16.mxu1 %v988_v28 }
 0x13a   : > { %v779_v34 = vadd.f32 %v778_v33, %v411_v31  ;;  %v780_v0 = vpop.f32.mrb[7].mxu0  ;;  %1212 = vmatpush1.bf16.msra.mxu1 %v987_v26  ;;  %v927_v36 = vmax.f32 %v775_v29, 0.0 }
 0x13b   : > { %v781_v35 = vadd.f32 %v780_v0, %v411_v31  ;;  %v928_v38 = vmax.f32 %v777_v32, 0.0  ;;  %v451_v32 = vpop.permute.xlu1 %450 }
 0x13c   : > { %v929_v37 = vmax.f32 %v779_v34, 0.0 }
 0x13d   : > { %v930_v39 = vmax.f32 %v781_v35, 0.0 }
 0x13e   : > { %v989_v40 = vpack.c.bf16 %v929_v37, %v927_v36 }
 0x13f   : > { %v990_v42 = vpack.c.bf16 %v930_v39, %v928_v38  ;;  %v784_v43 = vpop.f32.mrb[8].mxu0 }
 0x140   : > { %v785_v44 = vadd.f32 %v784_v43, %v416_v41  ;;  %v786_v45 = vpop.f32.mrb[9].mxu0 }
 0x141   : > { %v787_v47 = vadd.f32 %v786_v45, %v416_v41  ;;  %v788_v48 = vpop.f32.mrb[10].mxu0  ;;  %1213 = vmatprep.subr.bf16.mxu1 %v990_v42  ;;  %v456_v42 = vpop.permute.xlu0 %455 }
 0x142   : > { %v789_v49 = vadd.f32 %v788_v48, %v421_v46  ;;  %v790_v50 = vpop.f32.mrb[11].mxu0  ;;  %1214 = vmatpush1.bf16.msra.mxu1 %v989_v40  ;;  %v931_v52 = vmax.f32 %v785_v44, 0.0 }
 0x143   : > { %v791_v51 = vadd.f32 %v790_v50, %v421_v46  ;;  %v932_v54 = vmax.f32 %v787_v47, 0.0  ;;  %v461_v47 = vpop.permute.xlu1 %460 }
 0x144   : > { %v933_v53 = vmax.f32 %v789_v49, 0.0 }
 0x145   : > { %v934_v55 = vmax.f32 %v791_v51, 0.0 }
 0x146   : > { %v991_v56 = vpack.c.bf16 %v933_v53, %v931_v52 }
 0x147   : > { %v992_v58 = vpack.c.bf16 %v934_v55, %v932_v54  ;;  %v794_v59 = vpop.f32.mrb[12].mxu0 }
 0x148   : > { %v795_v60 = vadd.f32 %v794_v59, %v426_v57  ;;  %v796_v61 = vpop.f32.mrb[13].mxu0 }
 0x149   : > { %v797_v63 = vadd.f32 %v796_v61, %v426_v57  ;;  %v798_v2 = vpop.f32.mrb[14].mxu0  ;;  %1215 = vmatprep.subr.bf16.mxu1 %v992_v58  ;;  %v466_v58 = vpop.permute.xlu0 %465 }
 0x14a   : > { %v799_v3 = vadd.f32 %v798_v2, %v431_v62  ;;  %v800_v4 = vpop.f32.mrb[15].mxu0  ;;  %1216 = vmatpush1.bf16.msra.mxu1 %v991_v56  ;;  %v935_v6 = vmax.f32 %v795_v60, 0.0 }
 0x14b   : > { %v801_v5 = vadd.f32 %v800_v4, %v431_v62  ;;  %v936_v8 = vmax.f32 %v797_v63, 0.0  ;;  %v471_v63 = vpop.permute.xlu1 %470 }
 0x14c   : > { %v937_v7 = vmax.f32 %v799_v3, 0.0 }
 0x14d   : > { %v938_v9 = vmax.f32 %v801_v5, 0.0 }
 0x14e   : > { %v993_v10 = vpack.c.bf16 %v937_v7, %v935_v6 }
 0x14f   : > { %v994_v12 = vpack.c.bf16 %v938_v9, %v936_v8  ;;  %v804_v13 = vpop.f32.mrb[16].mxu0 }
 0x150   : > { %v805_v14 = vadd.f32 %v804_v13, %v436_v11  ;;  %v806_v15 = vpop.f32.mrb[17].mxu0 }
 0x151   : > { %v807_v17 = vadd.f32 %v806_v15, %v436_v11  ;;  %v808_v18 = vpop.f32.mrb[18].mxu0  ;;  %1217 = vmatprep.subr.bf16.mxu1 %v994_v12  ;;  %v476_v12 = vpop.permute.xlu0 %475 }
 0x152   : > { %v809_v19 = vadd.f32 %v808_v18, %v441_v16  ;;  %v810_v20 = vpop.f32.mrb[19].mxu0  ;;  %1218 = vmatpush1.bf16.msra.mxu1 %v993_v10  ;;  %v939_v22 = vmax.f32 %v805_v14, 0.0 }
 0x153   : > { %v811_v21 = vadd.f32 %v810_v20, %v441_v16  ;;  %v940_v24 = vmax.f32 %v807_v17, 0.0  ;;  %v481_v17 = vpop.permute.xlu1 %480 }
 0x154   : > { %v941_v23 = vmax.f32 %v809_v19, 0.0 }
 0x155   : > { %v942_v25 = vmax.f32 %v811_v21, 0.0 }
 0x156   : > { %v995_v26 = vpack.c.bf16 %v941_v23, %v939_v22 }
 0x157   : > { %v996_v28 = vpack.c.bf16 %v942_v25, %v940_v24  ;;  %v814_v29 = vpop.f32.mrb[20].mxu0 }
 0x158   : > { %v815_v30 = vadd.f32 %v814_v29, %v446_v27  ;;  %v816_v31 = vpop.f32.mrb[21].mxu0 }
 0x159   : > { %v817_v33 = vadd.f32 %v816_v31, %v446_v27  ;;  %v818_v34 = vpop.f32.mrb[22].mxu0  ;;  %1219 = vmatprep.subr.bf16.mxu1 %v996_v28  ;;  %v486_v28 = vpop.permute.xlu0 %485 }
 0x15a   : > { %v819_v0 = vadd.f32 %v818_v34, %v451_v32  ;;  %v820_v35 = vpop.f32.mrb[23].mxu0  ;;  %1220 = vmatpush1.bf16.msra.mxu1 %v995_v26  ;;  %v943_v37 = vmax.f32 %v815_v30, 0.0 }
 0x15b   : > { %v821_v36 = vadd.f32 %v820_v35, %v451_v32  ;;  %v944_v39 = vmax.f32 %v817_v33, 0.0  ;;  %v491_v33 = vpop.permute.xlu1 %490 }
 0x15c   : > { %v945_v38 = vmax.f32 %v819_v0, 0.0 }
 0x15d   : > { %v946_v40 = vmax.f32 %v821_v36, 0.0 }
 0x15e   : > { %v997_v41 = vpack.c.bf16 %v945_v38, %v943_v37 }
 0x15f   : > { %v998_v43 = vpack.c.bf16 %v946_v40, %v944_v39  ;;  %v824_v44 = vpop.f32.mrb[24].mxu0 }
 0x160   : > { %v825_v45 = vadd.f32 %v824_v44, %v456_v42  ;;  %v826_v46 = vpop.f32.mrb[25].mxu0 }
 0x161   : > { %v827_v48 = vadd.f32 %v826_v46, %v456_v42  ;;  %v828_v49 = vpop.f32.mrb[26].mxu0  ;;  %1221 = vmatprep.subr.bf16.mxu1 %v998_v43  ;;  %v496_v43 = vpop.permute.xlu0 %495 }
 0x162   : > { %v829_v50 = vadd.f32 %v828_v49, %v461_v47  ;;  %v830_v51 = vpop.f32.mrb[27].mxu0  ;;  %1222 = vmatpush1.bf16.msra.mxu1 %v997_v41  ;;  %v947_v53 = vmax.f32 %v825_v45, 0.0 }
 0x163   : > { %v831_v52 = vadd.f32 %v830_v51, %v461_v47  ;;  %v948_v55 = vmax.f32 %v827_v48, 0.0  ;;  %v501_v48 = vpop.permute.xlu1 %500 }
 0x164   : > { %v949_v54 = vmax.f32 %v829_v50, 0.0 }
 0x165   : > { %v950_v56 = vmax.f32 %v831_v52, 0.0 }
 0x166   : > { %v999_v57 = vpack.c.bf16 %v949_v54, %v947_v53 }
 0x167   : > { %v1000_v59 = vpack.c.bf16 %v950_v56, %v948_v55  ;;  %v834_v60 = vpop.f32.mrb[28].mxu0 }
 0x168   : > { %v835_v61 = vadd.f32 %v834_v60, %v466_v58  ;;  %v836_v62 = vpop.f32.mrb[29].mxu0 }
 0x169   : > { %v837_v2 = vadd.f32 %v836_v62, %v466_v58  ;;  %v838_v3 = vpop.f32.mrb[30].mxu0  ;;  %1223 = vmatprep.subr.bf16.mxu1 %v1000_v59  ;;  %v506_v59 = vpop.permute.xlu0 %505 }
 0x16a   : > { %v839_v4 = vadd.f32 %v838_v3, %v471_v63  ;;  %v840_v5 = vpop.f32.mrb[31].mxu0  ;;  %1224 = vmatpush1.bf16.msra.mxu1 %v999_v57  ;;  %v951_v7 = vmax.f32 %v835_v61, 0.0 }
 0x16b   : > { %v841_v6 = vadd.f32 %v840_v5, %v471_v63  ;;  %v952_v9 = vmax.f32 %v837_v2, 0.0  ;;  %v511_v2 = vpop.permute.xlu1 %510 }
 0x16c   : > { %v953_v8 = vmax.f32 %v839_v4, 0.0 }
 0x16d   : > { %v954_v10 = vmax.f32 %v841_v6, 0.0 }
 0x16e   : > { %v1001_v11 = vpack.c.bf16 %v953_v8, %v951_v7 }
 0x16f   : > { %v1002_v13 = vpack.c.bf16 %v954_v10, %v952_v9  ;;  %v844_v14 = vpop.f32.mrb[32].mxu0 }
 0x170   : > { %v845_v15 = vadd.f32 %v844_v14, %v476_v12  ;;  %v846_v16 = vpop.f32.mrb[33].mxu0 }
 0x171   : > { %v847_v18 = vadd.f32 %v846_v16, %v476_v12  ;;  %v848_v19 = vpop.f32.mrb[34].mxu0  ;;  %1225 = vmatprep.subr.bf16.mxu1 %v1002_v13  ;;  %v516_v13 = vpop.permute.xlu0 %515 }
 0x172   : > { %v849_v20 = vadd.f32 %v848_v19, %v481_v17  ;;  %v850_v21 = vpop.f32.mrb[35].mxu0  ;;  %1226 = vmatpush1.bf16.msra.mxu1 %v1001_v11  ;;  %v955_v23 = vmax.f32 %v845_v15, 0.0 }
 0x173   : > { %v851_v22 = vadd.f32 %v850_v21, %v481_v17  ;;  %v956_v25 = vmax.f32 %v847_v18, 0.0  ;;  %v521_v18 = vpop.permute.xlu1 %520 }
 0x174   : > { %v957_v24 = vmax.f32 %v849_v20, 0.0 }
 0x175   : > { %v958_v26 = vmax.f32 %v851_v22, 0.0 }
 0x176   : > { %v1003_v27 = vpack.c.bf16 %v957_v24, %v955_v23 }
 0x177   : > { %v1004_v29 = vpack.c.bf16 %v958_v26, %v956_v25  ;;  %v854_v30 = vpop.f32.mrb[36].mxu0 }
 0x178   : > { %v855_v31 = vadd.f32 %v854_v30, %v486_v28  ;;  %v856_v32 = vpop.f32.mrb[37].mxu0 }
 0x179   : > { %v857_v34 = vadd.f32 %v856_v32, %v486_v28  ;;  %v858_v0 = vpop.f32.mrb[38].mxu0  ;;  %1227 = vmatprep.subr.bf16.mxu1 %v1004_v29  ;;  %v526_v29 = vpop.permute.xlu0 %525 }
 0x17a   : > { %v859_v35 = vadd.f32 %v858_v0, %v491_v33  ;;  %v860_v36 = vpop.f32.mrb[39].mxu0  ;;  %1228 = vmatpush1.bf16.msra.mxu1 %v1003_v27  ;;  %v959_v38 = vmax.f32 %v855_v31, 0.0 }
 0x17b   : > { %v861_v37 = vadd.f32 %v860_v36, %v491_v33  ;;  %v960_v40 = vmax.f32 %v857_v34, 0.0  ;;  %v531_v34 = vpop.permute.xlu1 %530 }
 0x17c   : > { %v961_v39 = vmax.f32 %v859_v35, 0.0 }
 0x17d   : > { %v962_v41 = vmax.f32 %v861_v37, 0.0 }
 0x17e   : > { %v1005_v42 = vpack.c.bf16 %v961_v39, %v959_v38 }
 0x17f   : > { %v1006_v44 = vpack.c.bf16 %v962_v41, %v960_v40  ;;  %v864_v45 = vpop.f32.mrb[40].mxu0 }
 0x180   : > { %v865_v46 = vadd.f32 %v864_v45, %v496_v43  ;;  %v866_v47 = vpop.f32.mrb[41].mxu0 }
 0x181   : > { %v867_v49 = vadd.f32 %v866_v47, %v496_v43  ;;  %v868_v50 = vpop.f32.mrb[42].mxu0  ;;  %1229 = vmatprep.subr.bf16.mxu1 %v1006_v44  ;;  %v536_v44 = vpop.permute.xlu0 %535 }
 0x182   : > { %v869_v51 = vadd.f32 %v868_v50, %v501_v48  ;;  %v870_v52 = vpop.f32.mrb[43].mxu0  ;;  %1230 = vmatpush1.bf16.msra.mxu1 %v1005_v42  ;;  %v963_v54 = vmax.f32 %v865_v46, 0.0 }
 0x183   : > { %v871_v53 = vadd.f32 %v870_v52, %v501_v48  ;;  %v964_v56 = vmax.f32 %v867_v49, 0.0  ;;  %v541_v49 = vpop.permute.xlu1 %540 }
 0x184   : > { %v965_v55 = vmax.f32 %v869_v51, 0.0 }
 0x185   : > { %v966_v57 = vmax.f32 %v871_v53, 0.0 }
 0x186   : > { %v1007_v58 = vpack.c.bf16 %v965_v55, %v963_v54 }
 0x187   : > { %v1008_v60 = vpack.c.bf16 %v966_v57, %v964_v56  ;;  %v874_v61 = vpop.f32.mrb[44].mxu0 }
 0x188   : > { %v875_v62 = vadd.f32 %v874_v61, %v506_v59  ;;  %v876_v63 = vpop.f32.mrb[45].mxu0 }
 0x189   : > { %v877_v3 = vadd.f32 %v876_v63, %v506_v59  ;;  %v878_v4 = vpop.f32.mrb[46].mxu0  ;;  %1231 = vmatprep.subr.bf16.mxu1 %v1008_v60  ;;  %v546_v60 = vpop.permute.xlu0 %545 }
 0x18a   : > { %v879_v5 = vadd.f32 %v878_v4, %v511_v2  ;;  %v880_v6 = vpop.f32.mrb[47].mxu0  ;;  %1232 = vmatpush1.bf16.msra.mxu1 %v1007_v58  ;;  %v967_v8 = vmax.f32 %v875_v62, 0.0 }
 0x18b   : > { %v881_v7 = vadd.f32 %v880_v6, %v511_v2  ;;  %v968_v10 = vmax.f32 %v877_v3, 0.0  ;;  %v551_v3 = vpop.permute.xlu1 %550 }
 0x18c   : > { %v969_v9 = vmax.f32 %v879_v5, 0.0 }
 0x18d   : > { %v970_v11 = vmax.f32 %v881_v7, 0.0 }
 0x18e   : > { %v1009_v12 = vpack.c.bf16 %v969_v9, %v967_v8 }
 0x18f   : > { %v1010_v14 = vpack.c.bf16 %v970_v11, %v968_v10  ;;  %v884_v15 = vpop.f32.mrb[48].mxu0 }
 0x190   : > { %v885_v16 = vadd.f32 %v884_v15, %v516_v13  ;;  %v886_v17 = vpop.f32.mrb[49].mxu0  ;;  %v1993_v15 = vld [vmem:[%s2635_s2] ss:$8 sps:$4 sm:$0xff]  }
 0x191   : > { %v887_v19 = vadd.f32 %v886_v17, %v516_v13  ;;  %v888_v20 = vpop.f32.mrb[50].mxu0  ;;  %1233 = vmatprep.subr.bf16.mxu1 %v1010_v14  ;;  %v1998_v17 = vld [vmem:[%s2635_s2 + $0x10] ss:$8 sps:$4 sm:$0xff]  }
 0x192   : > { %v889_v21 = vadd.f32 %v888_v20, %v521_v18  ;;  %v890_v22 = vpop.f32.mrb[51].mxu0  ;;  %1234 = vmatpush1.bf16.msra.mxu1 %v1009_v12  ;;  %v971_v24 = vmax.f32 %v885_v16, 0.0  ;;  %v1996_v16 = vld [vmem:[%s2635_s2 + $0x14] ss:$8 sps:$4 sm:$0xff]  }
 0x193   : > { %v891_v23 = vadd.f32 %v890_v22, %v521_v18  ;;  %v972_v26 = vmax.f32 %v887_v19, 0.0  ;;  %v1999_v18 = vld [vmem:[%s2635_s2 + $0x24] ss:$8 sps:$4 sm:$0xff]   ;;  %v2001_v19 = vld [vmem:[%s2635_s2 + $0x20] ss:$8 sps:$4 sm:$0xff]  }
 0x194   : > { %v973_v25 = vmax.f32 %v889_v21, 0.0  ;;  %v2002_v20 = vld [vmem:[%s2635_s2 + $0x34] ss:$8 sps:$4 sm:$0xff]   ;;  %v2004_v21 = vld [vmem:[%s2635_s2 + $0x30] ss:$8 sps:$4 sm:$0xff]  }
 0x195   : > { %v974_v27 = vmax.f32 %v891_v23, 0.0  ;;  %v2005_v22 = vld [vmem:[%s2635_s2 + $0x44] ss:$8 sps:$4 sm:$0xff]   ;;  %v2007_v23 = vld [vmem:[%s2635_s2 + $0x40] ss:$8 sps:$4 sm:$0xff]  }
 0x196   : > { %v1011_v28 = vpack.c.bf16 %v973_v25, %v971_v24  ;;  %v2008_v24 = vld [vmem:[%s2635_s2 + $0x54] ss:$8 sps:$4 sm:$0xff]   ;;  %v2010_v25 = vld [vmem:[%s2635_s2 + $0x50] ss:$8 sps:$4 sm:$0xff]  }
 0x197   : > { %v1012_v30 = vpack.c.bf16 %v974_v27, %v972_v26  ;;  %v894_v31 = vpop.f32.mrb[52].mxu0  ;;  %v2011_v26 = vld [vmem:[%s2635_s2 + $0x64] ss:$8 sps:$4 sm:$0xff]   ;;  %v2013_v27 = vld [vmem:[%s2635_s2 + $0x60] ss:$8 sps:$4 sm:$0xff]  }
 0x198   : > { %v895_v32 = vadd.f32 %v894_v31, %v526_v29  ;;  %v896_v33 = vpop.f32.mrb[53].mxu0 }
 0x199   : > { %v897_v0 = vadd.f32 %v896_v33, %v526_v29  ;;  %v898_v35 = vpop.f32.mrb[54].mxu0  ;;  %1235 = vmatprep.subr.bf16.mxu1 %v1012_v30  ;;  %v2016_v29 = vld [vmem:[%s2635_s2 + $0x70] ss:$8 sps:$4 sm:$0xff]   ;;  %v1054_v30 = vpop.permute.xlu0 %1053 }
 0x19a   : > { %v899_v36 = vadd.f32 %v898_v35, %v531_v34  ;;  %v900_v37 = vpop.f32.mrb[55].mxu0  ;;  %1236 = vmatpush1.bf16.msra.mxu1 %v1011_v28  ;;  %v975_v39 = vmax.f32 %v895_v32, 0.0  ;;  %v2014_v28 = vld [vmem:[%s2635_s2 + $0x74] ss:$8 sps:$4 sm:$0xff]  }
 0x19b   : > { %v901_v38 = vadd.f32 %v900_v37, %v531_v34  ;;  %v976_v41 = vmax.f32 %v897_v0, 0.0  ;;  %v1059_v34 = vpop.permute.xlu1 %1058 }
 0x19c   : > { %v977_v40 = vmax.f32 %v899_v36, 0.0 }
 0x19d   : > { %v978_v42 = vmax.f32 %v901_v38, 0.0 }
 0x19e   : > { %v1013_v43 = vpack.c.bf16 %v977_v40, %v975_v39 }
 0x19f   : > { %v1014_v45 = vpack.c.bf16 %v978_v42, %v976_v41  ;;  %v904_v46 = vpop.f32.mrb[56].mxu0 }
 0x1a0   : > { %v905_v47 = vadd.f32 %v904_v46, %v536_v44  ;;  %v906_v48 = vpop.f32.mrb[57].mxu0 }
 0x1a1   : > { %v907_v50 = vadd.f32 %v906_v48, %v536_v44  ;;  %v908_v51 = vpop.f32.mrb[58].mxu0  ;;  %1237 = vmatprep.subr.bf16.mxu1 %v1014_v45  ;;  %v1064_v44 = vpop.permute.xlu0 %1063 }
 0x1a2   : > { %v909_v52 = vadd.f32 %v908_v51, %v541_v49  ;;  %v910_v53 = vpop.f32.mrb[59].mxu0  ;;  %1238 = vmatpush1.bf16.msra.mxu1 %v1013_v43  ;;  %v979_v55 = vmax.f32 %v905_v47, 0.0 }
 0x1a3   : > { %v911_v54 = vadd.f32 %v910_v53, %v541_v49  ;;  %v980_v57 = vmax.f32 %v907_v50, 0.0  ;;  %v1069_v49 = vpop.permute.xlu1 %1068 }
 0x1a4   : > { %v981_v56 = vmax.f32 %v909_v52, 0.0 }
 0x1a5   : > { %v982_v58 = vmax.f32 %v911_v54, 0.0 }
 0x1a6   : > { %v1015_v59 = vpack.c.bf16 %v981_v56, %v979_v55 }
 0x1a7   : > { %v1016_v61 = vpack.c.bf16 %v982_v58, %v980_v57  ;;  %v914_v62 = vpop.f32.mrb[60].mxu0 }
 0x1a8   : > { %v915_v63 = vadd.f32 %v914_v62, %v546_v60  ;;  %v916_v2 = vpop.f32.mrb[61].mxu0 }
 0x1a9   : > { %v917_v4 = vadd.f32 %v916_v2, %v546_v60  ;;  %v918_v5 = vpop.f32.mrb[62].mxu0  ;;  %1239 = vmatprep.subr.bf16.mxu1 %v1016_v61  ;;  %v1074_v60 = vpop.permute.xlu0 %1073 }
 0x1aa   : > { %v919_v6 = vadd.f32 %v918_v5, %v551_v3  ;;  %v920_v7 = vpop.f32.mrb[63].mxu0  ;;  %1240 = vmatpush1.bf16.msra.mxu1 %v1015_v59  ;;  %v983_v9 = vmax.f32 %v915_v63, 0.0 }
 0x1ab   : > { %v921_v8 = vadd.f32 %v920_v7, %v551_v3  ;;  %v984_v11 = vmax.f32 %v917_v4, 0.0  ;;  %v1079_v3 = vpop.permute.xlu1 %1078 }
 0x1ac   : > { %v985_v10 = vmax.f32 %v919_v6, 0.0 }
 0x1ad   : > { %v986_v12 = vmax.f32 %v921_v8, 0.0 }
 0x1ae   : > { %v1017_v13 = vpack.c.bf16 %v985_v10, %v983_v9 }
 0x1af   : > { %v1018_v14 = vpack.c.bf16 %v986_v12, %v984_v11 }
 0x1b1   : > { %1241 = vmatprep.subr.bf16.mxu1 %v1018_v14  ;;  %v1084_v14 = vpop.permute.xlu0 %1083 }
 0x1b2   : > { %1242 = vmatpush1.bf16.msra.mxu1 %v1017_v13 }
 0x1b5   : > { %1244 = vmatmul.mubr.bf16.vlgmr.msra.gmra.mrb[0].mxu1 %v1993_v15 }
 0x1b6   : > { %1253 = vmatprep.mubr.bf16.mxu1 %v1996_v16 }
 0x1bd   : > { %1254 = vmatmul.mubr.bf16.gmra.mrb[4].mxu1 %v1998_v17 }
 0x1be   : > { %1263 = vmatprep.mubr.bf16.mxu1 %v1999_v18 }
 0x1c5   : > { %1264 = vmatmul.mubr.bf16.gmra.mrb[8].mxu1 %v2001_v19  ;;  %v1089_v19 = vpop.permute.xlu1 %1088 }
 0x1c6   : > { %1273 = vmatprep.mubr.bf16.mxu1 %v2002_v20 }
 0x1cd   : > { %1274 = vmatmul.mubr.bf16.gmra.mrb[12].mxu1 %v2004_v21 }
 0x1ce   : > { %1283 = vmatprep.mubr.bf16.mxu1 %v2005_v22 }
 0x1d5   : > { %1284 = vmatmul.mubr.bf16.gmra.mrb[16].mxu1 %v2007_v23 }
 0x1d6   : > { %1293 = vmatprep.mubr.bf16.mxu1 %v2008_v24 }
 0x1dd   : > { %1294 = vmatmul.mubr.bf16.gmra.mrb[20].mxu1 %v2010_v25 }
 0x1de   : > { %1303 = vmatprep.mubr.bf16.mxu1 %v2011_v26 }
 0x1e5   : > { %1304 = vmatmul.mubr.bf16.gmra.mrb[24].mxu1 %v2013_v27 }
 0x1e6   : > { %1313 = vmatprep.mubr.bf16.mxu1 %v2014_v28 }
 0x1ed   : > { %1314 = vmatmul.mubr.bf16.gmra.mrb[28].mxu1 %v2016_v29 }
 0x1ee   : > { %1484 = vmatprep.mubr.bf16.mxu1 %v2088_v1 }
 0x288   : > { %v1245_v31 = vpop.f32.mrb[0].mxu1 }
 0x289   : > { %v1246_v32 = vadd.f32 %v1245_v31, %v1054_v30  ;;  %v1247_v33 = vpop.f32.mrb[1].mxu1 }
 0x28a   : > { %v1248_v0 = vadd.f32 %v1247_v33, %v1054_v30  ;;  %v1249_v35 = vpop.f32.mrb[2].mxu1  ;;  %v1094_v30 = vpop.permute.xlu0 %1093 }
 0x28b   : > { %v1250_v36 = vadd.f32 %v1249_v35, %v1059_v34  ;;  %v1251_v37 = vpop.f32.mrb[3].mxu1  ;;  %v1324_v39 = vmax.f32 %v1246_v32, 0.0 }
 0x28c   : > { %v1252_v38 = vadd.f32 %v1251_v37, %v1059_v34  ;;  %v1325_v41 = vmax.f32 %v1248_v0, 0.0  ;;  %v1099_v0 = vpop.permute.xlu1 %1098 }
 0x28d   : > { %v1326_v40 = vmax.f32 %v1250_v36, 0.0 }
 0x28e   : > { %v1327_v42 = vmax.f32 %v1252_v38, 0.0 }
 0x28f   : > { %v1356_v43 = vpack.c.bf16 %v1326_v40, %v1324_v39 }
 0x290   : > { %v1357_v45 = vpack.c.bf16 %v1327_v42, %v1325_v41  ;;  %v1255_v46 = vpop.f32.mrb[4].mxu1 }
 0x291   : > { %v1256_v47 = vadd.f32 %v1255_v46, %v1064_v44  ;;  %v1257_v48 = vpop.f32.mrb[5].mxu1 }
 0x292   : > { %v1258_v50 = vadd.f32 %v1257_v48, %v1064_v44  ;;  %v1259_v51 = vpop.f32.mrb[6].mxu1  ;;  %1452 = vmatprep.subr.bf16.mxu1 %v1357_v45  ;;  %v1104_v45 = vpop.permute.xlu0 %1103 }
 0x293   : > { %v1260_v52 = vadd.f32 %v1259_v51, %v1069_v49  ;;  %v1261_v53 = vpop.f32.mrb[7].mxu1  ;;  %1453 = vmatpush1.bf16.msra.mxu1 %v1356_v43  ;;  %v1328_v55 = vmax.f32 %v1256_v47, 0.0 }
 0x294   : > { %v1262_v54 = vadd.f32 %v1261_v53, %v1069_v49  ;;  %v1329_v57 = vmax.f32 %v1258_v50, 0.0  ;;  %v1109_v50 = vpop.permute.xlu1 %1108 }
 0x295   : > { %v1330_v56 = vmax.f32 %v1260_v52, 0.0 }
 0x296   : > { %v1331_v58 = vmax.f32 %v1262_v54, 0.0 }
 0x297   : > { %v1358_v59 = vpack.c.bf16 %v1330_v56, %v1328_v55 }
 0x298   : > { %v1359_v61 = vpack.c.bf16 %v1331_v58, %v1329_v57  ;;  %v1265_v62 = vpop.f32.mrb[8].mxu1 }
 0x299   : > { %v1266_v63 = vadd.f32 %v1265_v62, %v1074_v60  ;;  %v1267_v2 = vpop.f32.mrb[9].mxu1 }
 0x29a   : > { %v1268_v4 = vadd.f32 %v1267_v2, %v1074_v60  ;;  %v1269_v5 = vpop.f32.mrb[10].mxu1  ;;  %1454 = vmatprep.subr.bf16.mxu1 %v1359_v61  ;;  %v1114_v61 = vpop.permute.xlu0 %1113 }
 0x29b   : > { %v1270_v6 = vadd.f32 %v1269_v5, %v1079_v3  ;;  %v1271_v7 = vpop.f32.mrb[11].mxu1  ;;  %1455 = vmatpush1.bf16.msra.mxu1 %v1358_v59  ;;  %v1332_v9 = vmax.f32 %v1266_v63, 0.0 }
 0x29c   : > { %v1272_v8 = vadd.f32 %v1271_v7, %v1079_v3  ;;  %v1333_v11 = vmax.f32 %v1268_v4, 0.0  ;;  %v1119_v4 = vpop.permute.xlu1 %1118 }
 0x29d   : > { %v1334_v10 = vmax.f32 %v1270_v6, 0.0 }
 0x29e   : > { %v1335_v12 = vmax.f32 %v1272_v8, 0.0 }
 0x29f   : > { %v1360_v13 = vpack.c.bf16 %v1334_v10, %v1332_v9 }
 0x2a0   : > { %v1361_v15 = vpack.c.bf16 %v1335_v12, %v1333_v11  ;;  %v1275_v16 = vpop.f32.mrb[12].mxu1 }
 0x2a1   : > { %v1276_v17 = vadd.f32 %v1275_v16, %v1084_v14  ;;  %v1277_v18 = vpop.f32.mrb[13].mxu1 }
 0x2a2   : > { %v1278_v20 = vadd.f32 %v1277_v18, %v1084_v14  ;;  %v1279_v21 = vpop.f32.mrb[14].mxu1  ;;  %1456 = vmatprep.subr.bf16.mxu1 %v1361_v15  ;;  %v1124_v15 = vpop.permute.xlu0 %1123 }
 0x2a3   : > { %v1280_v22 = vadd.f32 %v1279_v21, %v1089_v19  ;;  %v1281_v23 = vpop.f32.mrb[15].mxu1  ;;  %1457 = vmatpush1.bf16.msra.mxu1 %v1360_v13  ;;  %v1336_v25 = vmax.f32 %v1276_v17, 0.0 }
 0x2a4   : > { %v1282_v24 = vadd.f32 %v1281_v23, %v1089_v19  ;;  %v1337_v27 = vmax.f32 %v1278_v20, 0.0  ;;  %v1129_v20 = vpop.permute.xlu1 %1128 }
 0x2a5   : > { %v1338_v26 = vmax.f32 %v1280_v22, 0.0 }
 0x2a6   : > { %v1339_v28 = vmax.f32 %v1282_v24, 0.0 }
 0x2a7   : > { %v1362_v29 = vpack.c.bf16 %v1338_v26, %v1336_v25 }
 0x2a8   : > { %v1363_v31 = vpack.c.bf16 %v1339_v28, %v1337_v27  ;;  %v1285_v32 = vpop.f32.mrb[16].mxu1 }
 0x2a9   : > { %v1286_v33 = vadd.f32 %v1285_v32, %v1094_v30  ;;  %v1287_v34 = vpop.f32.mrb[17].mxu1  ;;  %v2017_v32 = vld [vmem:[%s2636_s3] sm:$0xff]  }
 0x2aa   : > { %v1288_v35 = vadd.f32 %v1287_v34, %v1094_v30  ;;  %v1289_v36 = vpop.f32.mrb[18].mxu1  ;;  %1458 = vmatprep.subr.bf16.mxu1 %v1363_v31  ;;  %v2019_v34 = vld [vmem:[%s2636_s3 + $0x10] sm:$0xff]  }
 0x2ab   : > { %v1290_v37 = vadd.f32 %v1289_v36, %v1099_v0  ;;  %v1291_v38 = vpop.f32.mrb[19].mxu1  ;;  %1459 = vmatpush1.bf16.msra.mxu1 %v1362_v29  ;;  %v1340_v40 = vmax.f32 %v1286_v33, 0.0  ;;  %v2018_v33 = vld [vmem:[%s2636_s3 + $0x8] sm:$0xff]  }
 0x2ac   : > { %v1292_v39 = vadd.f32 %v1291_v38, %v1099_v0  ;;  %v1341_v42 = vmax.f32 %v1288_v35, 0.0  ;;  %v2020_v0 = vld [vmem:[%s2636_s3 + $0x18] sm:$0xff]   ;;  %v1391_v35 = vpop.permute.xlu0 %1390 }
 0x2ad   : > { %v1342_v41 = vmax.f32 %v1290_v37, 0.0 }
 0x2ae   : > { %v1343_v43 = vmax.f32 %v1292_v39, 0.0  ;;  %v1396_v39 = vpop.permute.xlu1 %1395 }
 0x2af   : > { %v1364_v44 = vpack.c.bf16 %v1342_v41, %v1340_v40 }
 0x2b0   : > { %v1365_v46 = vpack.c.bf16 %v1343_v43, %v1341_v42  ;;  %v1295_v47 = vpop.f32.mrb[20].mxu1 }
 0x2b1   : > { %v1296_v48 = vadd.f32 %v1295_v47, %v1104_v45  ;;  %v1297_v49 = vpop.f32.mrb[21].mxu1 }
 0x2b2   : > { %v1298_v51 = vadd.f32 %v1297_v49, %v1104_v45  ;;  %v1299_v52 = vpop.f32.mrb[22].mxu1  ;;  %1460 = vmatprep.subr.bf16.mxu1 %v1365_v46 }
 0x2b3   : > { %v1300_v53 = vadd.f32 %v1299_v52, %v1109_v50  ;;  %v1301_v54 = vpop.f32.mrb[23].mxu1  ;;  %1461 = vmatpush1.bf16.msra.mxu1 %v1364_v44  ;;  %v1344_v56 = vmax.f32 %v1296_v48, 0.0 }
 0x2b4   : > { %v1302_v55 = vadd.f32 %v1301_v54, %v1109_v50  ;;  %v1345_v58 = vmax.f32 %v1298_v51, 0.0  ;;  %v1401_v50 = vpop.permute.xlu0 %1400 }
 0x2b5   : > { %v1346_v57 = vmax.f32 %v1300_v53, 0.0 }
 0x2b6   : > { %v1347_v59 = vmax.f32 %v1302_v55, 0.0  ;;  %v1406_v55 = vpop.permute.xlu1 %1405 }
 0x2b7   : > { %v1366_v60 = vpack.c.bf16 %v1346_v57, %v1344_v56 }
 0x2b8   : > { %v1367_v62 = vpack.c.bf16 %v1347_v59, %v1345_v58  ;;  %v1305_v63 = vpop.f32.mrb[24].mxu1 }
 0x2b9   : > { %v1306_v2 = vadd.f32 %v1305_v63, %v1114_v61  ;;  %v1307_v3 = vpop.f32.mrb[25].mxu1 }
 0x2ba   : > { %v1308_v5 = vadd.f32 %v1307_v3, %v1114_v61  ;;  %v1309_v6 = vpop.f32.mrb[26].mxu1  ;;  %1462 = vmatprep.subr.bf16.mxu1 %v1367_v62 }
 0x2bb   : > { %v1310_v7 = vadd.f32 %v1309_v6, %v1119_v4  ;;  %v1311_v8 = vpop.f32.mrb[27].mxu1  ;;  %1463 = vmatpush1.bf16.msra.mxu1 %v1366_v60  ;;  %v1348_v10 = vmax.f32 %v1306_v2, 0.0 }
 0x2bc   : > { %v1312_v9 = vadd.f32 %v1311_v8, %v1119_v4  ;;  %v1349_v12 = vmax.f32 %v1308_v5, 0.0  ;;  %v1411_v4 = vpop.permute.xlu0 %1410 }
 0x2bd   : > { %v1350_v11 = vmax.f32 %v1310_v7, 0.0 }
 0x2be   : > { %v1351_v13 = vmax.f32 %v1312_v9, 0.0  ;;  %v1416_v9 = vpop.permute.xlu1 %1415 }
 0x2bf   : > { %v1368_v14 = vpack.c.bf16 %v1350_v11, %v1348_v10 }
 0x2c0   : > { %v1369_v16 = vpack.c.bf16 %v1351_v13, %v1349_v12  ;;  %v1315_v17 = vpop.f32.mrb[28].mxu1 }
 0x2c1   : > { %v1316_v18 = vadd.f32 %v1315_v17, %v1124_v15  ;;  %v1317_v19 = vpop.f32.mrb[29].mxu1 }
 0x2c2   : > { %v1318_v21 = vadd.f32 %v1317_v19, %v1124_v15  ;;  %v1319_v22 = vpop.f32.mrb[30].mxu1  ;;  %1464 = vmatprep.subr.bf16.mxu1 %v1369_v16 }
 0x2c3   : > { %v1320_v23 = vadd.f32 %v1319_v22, %v1129_v20  ;;  %v1321_v24 = vpop.f32.mrb[31].mxu1  ;;  %1465 = vmatpush1.bf16.msra.mxu1 %v1368_v14  ;;  %v1352_v26 = vmax.f32 %v1316_v18, 0.0 }
 0x2c4   : > { %v1322_v25 = vadd.f32 %v1321_v24, %v1129_v20  ;;  %v1353_v28 = vmax.f32 %v1318_v21, 0.0  ;;  %v1421_v20 = vpop.permute.xlu0 %1420 }
 0x2c5   : > { %v1354_v27 = vmax.f32 %v1320_v23, 0.0 }
 0x2c6   : > { %v1355_v29 = vmax.f32 %v1322_v25, 0.0  ;;  %v1426_v25 = vpop.permute.xlu1 %1425 }
 0x2c7   : > { %v1370_v30 = vpack.c.bf16 %v1354_v27, %v1352_v26 }
 0x2c8   : > { %v1371_v31 = vpack.c.bf16 %v1355_v29, %v1353_v28 }
 0x2ca   : > { %1466 = vmatprep.subr.bf16.mxu1 %v1371_v31 }
 0x2cb   : > { %1467 = vmatpush1.bf16.msra.mxu1 %v1370_v30 }
 0x2ce   : > { %1485 = vmatmul.mubr.bf16.vlgmr.msra.gmra.mrb[32].mxu1 %v2017_v32 }
 0x2cf   : > { %1494 = vmatprep.mubr.bf16.mxu1 %v2088_v1 }
 0x2d6   : > { %1495 = vmatmul.mubr.bf16.gmra.mrb[36].mxu1 %v2018_v33 }
 0x2d7   : > { %1504 = vmatprep.mubr.bf16.mxu1 %v2088_v1 }
 0x2de   : > { %1505 = vmatmul.mubr.bf16.gmra.mrb[40].mxu1 %v2019_v34 }
 0x2df   : > { %1514 = vmatprep.mubr.bf16.mxu1 %v2088_v1 }
 0x2e6   : > { %1515 = vmatmul.mubr.bf16.gmra.mrb[44].mxu1 %v2020_v0 }
 0x2e7   : > { %1626 = vmatprep.mubr.bf16.mxu1 %v2088_v1 }
 0x3a1   : > { %v1486_v36 = vpop.f32.mrb[32].mxu1 }
 0x3a2   : > { %v1487_v37 = vadd.f32 %v1486_v36, %v1391_v35  ;;  %v1488_v38 = vpop.f32.mrb[33].mxu1  ;;  %v2021_v36 = vld [vmem:[%s2637_s4] sm:$0xff]  }
 0x3a3   : > { %v1489_v40 = vadd.f32 %v1488_v38, %v1391_v35  ;;  %v1490_v41 = vpop.f32.mrb[34].mxu1  ;;  %v1560_v38 = vpop.permute.xlu0 %1559 }
 0x3a4   : > { %v1491_v42 = vadd.f32 %v1490_v41, %v1396_v39  ;;  %v1492_v43 = vpop.f32.mrb[35].mxu1  ;;  %v1525_v45 = vmax.f32 %v1487_v37, 0.0  ;;  %v2022_v37 = vld [vmem:[%s2637_s4 + $0x8] sm:$0xff]  }
 0x3a5   : > { %v1493_v44 = vadd.f32 %v1492_v43, %v1396_v39  ;;  %v1526_v47 = vmax.f32 %v1489_v40, 0.0 }
 0x3a6   : > { %v1527_v46 = vmax.f32 %v1491_v42, 0.0  ;;  %v1565_v42 = vpop.permute.xlu1 %1564 }
 0x3a7   : > { %v1528_v48 = vmax.f32 %v1493_v44, 0.0 }
 0x3a8   : > { %v1541_v49 = vpack.c.bf16 %v1527_v46, %v1525_v45 }
 0x3a9   : > { %v1542_v51 = vpack.c.bf16 %v1528_v48, %v1526_v47  ;;  %v1496_v52 = vpop.f32.mrb[36].mxu1 }
 0x3aa   : > { %v1497_v53 = vadd.f32 %v1496_v52, %v1401_v50  ;;  %v1498_v54 = vpop.f32.mrb[37].mxu1 }
 0x3ab   : > { %v1499_v56 = vadd.f32 %v1498_v54, %v1401_v50  ;;  %v1500_v57 = vpop.f32.mrb[38].mxu1  ;;  %1594 = vmatprep.subr.bf16.mxu1 %v1542_v51 }
 0x3ac   : > { %v1501_v58 = vadd.f32 %v1500_v57, %v1406_v55  ;;  %v1502_v59 = vpop.f32.mrb[39].mxu1  ;;  %1595 = vmatpush1.bf16.msra.mxu1 %v1541_v49  ;;  %v1529_v61 = vmax.f32 %v1497_v53, 0.0  ;;  %v1570_v53 = vpop.permute.xlu0 %1569 }
 0x3ad   : > { %v1503_v60 = vadd.f32 %v1502_v59, %v1406_v55  ;;  %v1530_v63 = vmax.f32 %v1499_v56, 0.0  ;;  %v1575_v57 = vpop.permute.xlu1 %1574 }
 0x3ae   : > { %v1531_v62 = vmax.f32 %v1501_v58, 0.0 }
 0x3af   : > { %v1532_v2 = vmax.f32 %v1503_v60, 0.0 }
 0x3b0   : > { %v1543_v3 = vpack.c.bf16 %v1531_v62, %v1529_v61 }
 0x3b1   : > { %v1544_v5 = vpack.c.bf16 %v1532_v2, %v1530_v63  ;;  %v1506_v6 = vpop.f32.mrb[40].mxu1 }
 0x3b2   : > { %v1507_v7 = vadd.f32 %v1506_v6, %v1411_v4  ;;  %v1508_v8 = vpop.f32.mrb[41].mxu1 }
 0x3b3   : > { %v1509_v10 = vadd.f32 %v1508_v8, %v1411_v4  ;;  %v1510_v11 = vpop.f32.mrb[42].mxu1  ;;  %1596 = vmatprep.subr.bf16.mxu1 %v1544_v5  ;;  %v1666_v8 = vpop.permute.xlu0 %1665 }
 0x3b4   : > { %v1511_v12 = vadd.f32 %v1510_v11, %v1416_v9  ;;  %v1512_v13 = vpop.f32.mrb[43].mxu1  ;;  %1597 = vmatpush1.bf16.msra.mxu1 %v1543_v3  ;;  %v1533_v15 = vmax.f32 %v1507_v7, 0.0  ;;  %v2023_v7 = vld [vmem:[%s2638_s5] sm:$0x1f]  }
 0x3b5   : > { %v1513_v14 = vadd.f32 %v1512_v13, %v1416_v9  ;;  %v1534_v17 = vmax.f32 %v1509_v10, 0.0 }
 0x3b6   : > { %v1535_v16 = vmax.f32 %v1511_v12, 0.0  ;;  %v1671_v12 = vpop.permute.xlu1 %1670 }
 0x3b7   : > { %v1536_v18 = vmax.f32 %v1513_v14, 0.0 }
 0x3b8   : > { %v1545_v19 = vpack.c.bf16 %v1535_v16, %v1533_v15 }
 0x3b9   : > { %v1546_v21 = vpack.c.bf16 %v1536_v18, %v1534_v17  ;;  %v1516_v22 = vpop.f32.mrb[44].mxu1 }
 0x3ba   : > { %v1517_v23 = vadd.f32 %v1516_v22, %v1421_v20  ;;  %v1518_v24 = vpop.f32.mrb[45].mxu1 }
 0x3bb   : > { %v1519_v26 = vadd.f32 %v1518_v24, %v1421_v20  ;;  %v1520_v27 = vpop.f32.mrb[46].mxu1  ;;  %1598 = vmatprep.subr.bf16.mxu1 %v1546_v21 }
 0x3bc   : > { %v1521_v28 = vadd.f32 %v1520_v27, %v1426_v25  ;;  %v1522_v29 = vpop.f32.mrb[47].mxu1  ;;  %1599 = vmatpush1.bf16.msra.mxu1 %v1545_v19  ;;  %v1537_v31 = vmax.f32 %v1517_v23, 0.0 }
 0x3bd   : > { %v1523_v30 = vadd.f32 %v1522_v29, %v1426_v25  ;;  %v1538_v33 = vmax.f32 %v1519_v26, 0.0 }
 0x3be   : > { %v1539_v32 = vmax.f32 %v1521_v28, 0.0 }
 0x3bf   : > { %v1540_v34 = vmax.f32 %v1523_v30, 0.0 }
 0x3c0   : > { %v1547_v0 = vpack.c.bf16 %v1539_v32, %v1537_v31 }
 0x3c1   : > { %v1548_v35 = vpack.c.bf16 %v1540_v34, %v1538_v33 }
 0x3c3   : > { %1600 = vmatprep.subr.bf16.mxu1 %v1548_v35 }
 0x3c4   : > { %1601 = vmatpush1.bf16.msra.mxu1 %v1547_v0 }
 0x3c7   : > { %1866 = vmatmul.mubr.msk.bf16.vlgmr.msra.gmra.mrb[48].mxu1 %vm1587_vm1, %v2021_v36 }
 0x3c8   : > { %1636 = vmatprep.mubr.bf16.mxu1 %v2088_v1 }
 0x3cf   : > { %1867 = vmatmul.mubr.msk.bf16.gmra.mrb[52].mxu1 %vm1587_vm1, %v2022_v37 }
 0x3d0   : > { %1714 = vmatprep.mubr.bf16.mxu1 %v2088_v1 }
 0x49a   : > { %v1628_v39 = vpop.f32.mrb[48].mxu1 }
 0x49b   : > { %v1629_v40 = vadd.f32 %v1628_v39, %v1560_v38  ;;  %v1630_v41 = vpop.f32.mrb[49].mxu1 }
 0x49c   : > { %v1631_v43 = vadd.f32 %v1630_v41, %v1560_v38  ;;  %v1632_v44 = vpop.f32.mrb[50].mxu1 }
 0x49d   : > { %v1633_v45 = vadd.f32 %v1632_v44, %v1565_v42  ;;  %v1634_v46 = vpop.f32.mrb[51].mxu1  ;;  %v1647_v48 = vmax.f32 %v1629_v40, 0.0 }
 0x49e   : > { %v1635_v47 = vadd.f32 %v1634_v46, %v1565_v42  ;;  %v1648_v50 = vmax.f32 %v1631_v43, 0.0 }
 0x49f   : > { %v1649_v49 = vmax.f32 %v1633_v45, 0.0 }
 0x4a0   : > { %v1650_v51 = vmax.f32 %v1635_v47, 0.0 }
 0x4a1   : > { %v1655_v52 = vpack.c.bf16 %v1649_v49, %v1647_v48 }
 0x4a2   : > { %v1656_v54 = vpack.c.bf16 %v1650_v51, %v1648_v50  ;;  %v1638_v55 = vpop.f32.mrb[52].mxu1 }
 0x4a3   : > { %v1639_v56 = vadd.f32 %v1638_v55, %v1570_v53  ;;  %v1640_v1 = vpop.f32.mrb[53].mxu1 }
 0x4a4   : > { %v1641_v58 = vadd.f32 %v1640_v1, %v1570_v53  ;;  %v1642_v59 = vpop.f32.mrb[54].mxu1  ;;  %1682 = vmatprep.subr.bf16.mxu1 %v1656_v54 }
 0x4a5   : > { %v1643_v60 = vadd.f32 %v1642_v59, %v1575_v57  ;;  %v1644_v61 = vpop.f32.mrb[55].mxu1  ;;  %1683 = vmatpush1.bf16.msra.mxu1 %v1655_v52  ;;  %v1651_v63 = vmax.f32 %v1639_v56, 0.0 }
 0x4a6   : > { %v1645_v62 = vadd.f32 %v1644_v61, %v1575_v57  ;;  %v1652_v3 = vmax.f32 %v1641_v58, 0.0 }
 0x4a7   : > { %v1653_v2 = vmax.f32 %v1643_v60, 0.0 }
 0x4a8   : > { %v1654_v4 = vmax.f32 %v1645_v62, 0.0 }
 0x4a9   : > { %v1657_v5 = vpack.c.bf16 %v1653_v2, %v1651_v63 }
 0x4aa   : > { %v1658_v6 = vpack.c.bf16 %v1654_v4, %v1652_v3 }
 0x4ac   : > { %1684 = vmatprep.subr.bf16.mxu1 %v1658_v6 }
 0x4ad   : > { %1685 = vmatpush1.bf16.msra.mxu1 %v1657_v5 }
 0x4b0   : > { %1869 = vmatmul.mubr.msk.bf16.vlgmr.msra.gmra.mrb[56].mxu1 %vm1678_vm2, %v2023_v7 }
 0x583   : > { %v1716_v9 = vpop.f32.mrb[56].mxu1 }
 0x584   : > { %v1717_v10 = vadd.f32 %v1716_v9, %v1666_v8  ;;  %v1718_v11 = vpop.f32.mrb[57].mxu1 }
 0x585   : > { %v1719_v13 = vadd.f32 %v1718_v11, %v1666_v8  ;;  %v1720_v14 = vpop.f32.mrb[58].mxu1 }
 0x586   : > { %1725 = vst [vmem:[%s272_s15] sm:$0xff] %v1717_v10  ;;  %v1721_v15 = vadd.f32 %v1720_v14, %v1671_v12  ;;  %v1722_v16 = vpop.f32.mrb[59].mxu1 }
 0x587   : > { %1726 = vst [vmem:[%s272_s15 + $0x8] sm:$0xff] %v1719_v13  ;;  %v1723_v17 = vadd.f32 %v1722_v16, %v1671_v12 }
 0x588   : > { %1727 = vst [vmem:[%s272_s15 + $0x10] sm:$0x1] %v1721_v15 }
 0x589   : > { %1728 = vst [vmem:[%s272_s15 + $0x18] sm:$0x1] %v1723_v17 }
 0x58a   : > { %2037 = shalt.err (!%p2034_p3)
}
 0x58b   : > { %s2038_s9 = scalar_lea.hbm %s2590_s20, 512  ;;  %s2042_s13 = scalar_lea.hbm %s2640_s7, 1024 }
 0x58c   : > { %p2039_p4 = scmp.ne.s32.totalorder %s2590_s20, %s2038_s9  ;;  %p2043_p9 = scmp.lt.u32.totalorder %s2590_s20, %s2640_s7 }
 0x58d   : > { %p2044_p10 = scmp.lt.u32.totalorder %s2042_s13, %s2038_s9  ;;  %p2046_p12 = scmp.lt.u32.totalorder %s2038_s9, %s2590_s20 }
 0x58e   : > { %p2040_p7 = pnand %p2039_p4, %p2171_p5 }
 0x58f   : > { %p2045_p11 = por %p2044_p10, %p2043_p9 }
 0x590   : > { %p2041_p8 = pneg %p2040_p7 }
 0x591   : > { %p2047_p13 = por %p2046_p12, %p2045_p11 }
 0x593   : > { %p2048_p0 = pnand %p2047_p13, %p2041_p8 }
 0x595   : > { %2051 = shalt.err (!%p2048_p0)
}
 0x596   : > { %s2090_s18 = smov 256   ;;  %s2091_s19 = smov 512  }
 0x597   : > { %s2092_s21 = smov 16  }
 0x598   : > { %1932 = dma.vmem_to_hbm [thread:$0]  (%p2171_p5), %s2585_s16, 512, %s2590_s20, %s2592_s28, %s2090_s18, %s2091_s19, %s2092_s21  }
 0x599 PF: > { %p1938_p1 = scmp.ge.s32.totalorder %s2086_s27, 2  ;;  %s1758_s22 = sand.u32 1, %s2074_s24  }
 0x59a   : > { %s1759_s23 = scalar_lea.sflag [#allocation3], %s1758_s22 }
 0x59b   : > { %p1935_p2 = pnand %p1938_p1, %p2175_p6 }
 0x59d   : > { %2069 = dma.done.wait (!%p1935_p2), %s1759_s23, 512  }
 0x59e   : > { %2071 = vsyncadd (!%p1935_p2), %s1759_s23, 4294966784  ;;  %p17_p3 = scmp.ge.s32.totalorder %s2158_s30, 4   ;;  %s2643_s24 = smov %s2078_s25 }
 0x59f   : > { %s2644_s25 = smov %s2082_s26  ;;  %s2645_s26 = smov %s2169_s10 }
 0x5a0   : > { %s2646_s27 = smov %s2158_s30  ;;  %19 = sbr.rel (!%p17_p3) target bundleno = 3 (0x3), region = 83 }
 0x5a7   :  { %1764 = vsyncpa [#allocation3], 1 }
 0x5a8   :  { %1766 = vsyncpa [#allocation3 + $0x1], 1 }

</bundles_post_ra>
